<compile_context>
chip_gen: v5e
topology: v5e:2x2
jax: 0.10.0
libtpu: 0.0.40
codegen_flags: <defaults>
</compile_context>

<pallas_src>
import functools

import jax
import jax.numpy as jnp
from jax.experimental import pallas as pl
from jax.experimental.pallas import tpu as pltpu

EPS = 1e-5    # MUNIT LayerNorm eps; normalization is (x - mean) / (std + eps)
LANE = 128    # TPU lane width; output channels padded to a multiple of this


def _conv_ln_relu_kernel(x_ref, w_ref, b_ref, g_ref, beta_ref, o_ref,
                         *, ho, wo, c_valid):
    # x_ref:    (1, 4, Ho+1, Wo+1, Cx) bf16  stride-2 phase split of the padded input
    # w_ref:    (9, Cx, CP)            bf16  per-tap weight, Cin rows / Cout cols zero-padded
    # b_ref:    (1, CP)                f32   conv bias  (zero-padded)
    # g_ref:    (1, CP)                f32   LN gamma   (zero-padded)
    # beta_ref: (1, CP)                f32   LN beta    (zero-padded)
    # o_ref:    (1, P, CP)             bf16  lane-dense output (pad cols are exactly zero)
    cp = o_ref.shape[-1]
    p = ho * wo

    # --- conv: in-kernel im2col as 9 tap slices of the VMEM phase block, 9 MXU
    # matmuls accumulated in f32 (bf16 operands). ---------------------------------
    acc = jnp.zeros((p, cp), jnp.float32)
    for kh in range(3):
        for kw in range(3):
            t = kh * 3 + kw
            ph = (kh % 2) * 2 + (kw % 2)          # which of the 4 phases
            dh, dw = kh // 2, kw // 2             # 0/1 offset inside the phase
            tap = x_ref[0, ph, dh:dh + ho, dw:dw + wo, :]      # (ho, wo, Cx)
            tap = tap.reshape(p, tap.shape[-1])                # (P, Cx)
            acc = acc + jnp.dot(tap, w_ref[t],
                                preferred_element_type=jnp.float32)

    y = acc + b_ref[...]                                       # (P, CP) f32

    # --- MUNIT LayerNorm: per-sample stats over (P, Cout).  Single mask-free pass:
    # padded columns of y are exactly zero (zero weight cols + zero bias), so the
    # unmasked sums over all CP columns equal the sums over the valid Cout columns.
    n = p * c_valid
    s1 = jnp.sum(jnp.sum(y, axis=1, keepdims=True), axis=0, keepdims=True)     # (1,1)
    s2 = jnp.sum(jnp.sum(y * y, axis=1, keepdims=True), axis=0, keepdims=True)  # (1,1)
    mean = s1 / n
    var = (s2 - n * mean * mean) / (n - 1)        # unbiased, matches torch .std()
    var = jnp.maximum(var, 0.0)                   # guard f32 cancellation
    inv = pl.reciprocal(jnp.sqrt(var) + EPS, approx=True)      # EUP path, eps on std
    yn = (y - mean) * inv
    out = jnp.maximum(yn * g_ref[...] + beta_ref[...], 0.0)    # affine + ReLU

    o_ref[...] = out.astype(o_ref.dtype).reshape(1, p, cp)     # bf16 store


def conv_block_nhwc(x_nhwc, w, b, gamma, beta):
    """Conv2dBlock(in,out, k=3, s=2, p=1, pad='reflect', norm='ln', act='relu').

    Activations are channel-last; the block KEEPS CP=128 lane-dense channels on its
    output (extra channels are exactly zero), so the next block never needs a slice.
    """
    N, H, W, Cx = x_nhwc.shape                     # Cx may already be lane-padded
    Cout, Cin = w.shape[0], w.shape[1]
    CP = ((Cout + LANE - 1) // LANE) * LANE
    Ho = (H - 1) // 2 + 1
    Wo = (W - 1) // 2 + 1
    He, We = Ho + 1, Wo + 1
    P = Ho * Wo

    # ReflectionPad2d(1) + stride-2 phase split: wrapper layout glue (~1x activation
    # traffic, fused by XLA) — NOT the 9x im2col duplication of the old version.
    xp = jnp.pad(x_nhwc, ((0, 0), (1, 1), (1, 1), (0, 0)), mode="reflect")
    Hp, Wp = H + 2, W + 2
    pad_h, pad_w = max(0, 2 * He - Hp), max(0, 2 * We - Wp)
    if pad_h or pad_w:
        xp = jnp.pad(xp, ((0, 0), (0, pad_h), (0, pad_w), (0, 0)))
    phases = [xp[:, ph:ph + 2 * He:2, pw:pw + 2 * We:2, :]
              for ph in range(2) for pw in range(2)]           # 4 x (N, He, We, Cx)
    xph = jnp.stack(phases, axis=1).astype(jnp.bfloat16)       # (N, 4, He, We, Cx)

    # PyTorch weight (Cout, Cin, 3, 3) -> (9, Cx, CP): tap-major, zero-pad the input
    # channels up to the activation width Cx and the output channels up to CP.
    wm = jnp.transpose(w, (2, 3, 1, 0)).reshape(9, Cin, Cout)
    wm = jnp.pad(wm, ((0, 0), (0, Cx - Cin), (0, CP - Cout))).astype(jnp.bfloat16)
    b2 = jnp.pad(b.reshape(1, Cout), ((0, 0), (0, CP - Cout))).astype(jnp.float32)
    g2 = jnp.pad(gamma.reshape(1, Cout), ((0, 0), (0, CP - Cout))).astype(jnp.float32)
    be2 = jnp.pad(beta.reshape(1, Cout), ((0, 0), (0, CP - Cout))).astype(jnp.float32)

    kernel = functools.partial(_conv_ln_relu_kernel, ho=Ho, wo=Wo, c_valid=Cout)

    out = pl.pallas_call(
        kernel,
        out_shape=jax.ShapeDtypeStruct((N, P, CP), jnp.bfloat16),
        grid_spec=pltpu.PrefetchScalarGridSpec(
            num_scalar_prefetch=0,
            grid=(N,),                                         # one sample per step
            in_specs=[
                pl.BlockSpec((1, 4, He, We, Cx), lambda n: (n, 0, 0, 0, 0)),
                pl.BlockSpec((9, Cx, CP), lambda n: (0, 0, 0)),
                pl.BlockSpec((1, CP), lambda n: (0, 0)),
                pl.BlockSpec((1, CP), lambda n: (0, 0)),
                pl.BlockSpec((1, CP), lambda n: (0, 0)),
            ],
            out_specs=pl.BlockSpec((1, P, CP), lambda n: (n, 0, 0)),
        ),
        compiler_params=pltpu.CompilerParams(
            dimension_semantics=("parallel",),                 # shard batch over TCs (v7x)
            vmem_limit_bytes=40 * 1024 * 1024,                 # > v5e 16 MiB default, < v7x 64 MiB
        ),
    )(xph, wm, b2, g2, be2)

    # Free metadata reshape; lane-dense CP channels kept for the next block.
    return out.reshape(N, Ho, Wo, CP)


def init_params(key, out_channels):
    """Deterministic synthetic parameters matching ContentEncoder.__init__ shapes."""
    cfg = [32, out_channels]
    in_c = 3
    params = []
    for v in cfg:
        key, k_w, k_b, k_g = jax.random.split(key, 4)
        w = jax.random.normal(k_w, (v, in_c, 3, 3), jnp.float32) * 0.1   # Conv2d weight
        b = jax.random.normal(k_b, (v,), jnp.float32) * 0.01             # Conv2d bias
        gamma = jax.random.uniform(k_g, (v,), jnp.float32)               # LN gamma
        beta = jnp.zeros((v,), jnp.float32)                              # LN beta
        params.append((w, b, gamma, beta))
        in_c = v
    return params


def content_encoder(x_nchw, params):
    # nn.Sequential of the two Conv2dBlocks; NCHW only at the module boundary.
    x = jnp.transpose(x_nchw, (0, 2, 3, 1))                   # NCHW -> NHWC once
    for (w, b, g, be) in params:
        x = conv_block_nhwc(x, w, b, g, be)
    cout = params[-1][0].shape[0]
    x = x[..., :cout]                                         # drop lane padding once
    return jnp.transpose(x, (0, 3, 1, 2)).astype(jnp.float32)  # NHWC -> NCHW once


if __name__ == "__main__":
    key = jax.random.PRNGKey(0)
    k_x, k_p = jax.random.split(key)

    out_channels = 64
    x = jax.random.normal(k_x, (2, 3, 16, 16), jnp.float32)   # NCHW, like PyTorch
    params = init_params(k_p, out_channels)

    encoder = jax.jit(content_encoder)
    feature = jax.block_until_ready(encoder(x, params))

    # (2,3,16,16) -> conv s2 -> (2,32,8,8) -> conv s2 -> (2,64,4,4)
    assert feature.shape == (2, out_channels, 4, 4), feature.shape
    assert bool(jnp.all(feature >= 0.0))  # ReLU output
    print("KERNEL_OK")
</pallas_src>

<mosaic_0001>
module attributes {stable_mosaic.version = 11 : i64} {
  func.func @_conv_ln_relu_kernel(%arg0: i32, %arg1: memref<1x4x9x9x3xbf16, #tpu.memory_space<vmem>>, %arg2: memref<9x3x128xbf16, #tpu.memory_space<vmem>>, %arg3: memref<1x128xf32, #tpu.memory_space<vmem>>, %arg4: memref<1x128xf32, #tpu.memory_space<vmem>>, %arg5: memref<1x128xf32, #tpu.memory_space<vmem>>, %arg6: memref<1x64x128xbf16, #tpu.memory_space<vmem>>) attributes {dimension_semantics = [#tpu.dimension_semantics<parallel>], iteration_bounds = array<i64: 2>, scalar_prefetch = 0 : i64, scratch_operands = 0 : i64, tpu.core_type = #tpu.core_type<tc>, window_params = [{transform_indices = @transform_0, window_bounds = array<i64: 1, 4, 9, 9, 3>}, {pipeline_mode = #tpu.pipeline_mode<synchronous>, transform_indices = @transform_1, window_bounds = array<i64: 9, 3, 128>}, {pipeline_mode = #tpu.pipeline_mode<synchronous>, transform_indices = @transform_2, window_bounds = array<i64: 1, 128>}, {pipeline_mode = #tpu.pipeline_mode<synchronous>, transform_indices = @transform_3, window_bounds = array<i64: 1, 128>}, {pipeline_mode = #tpu.pipeline_mode<synchronous>, transform_indices = @transform_4, window_bounds = array<i64: 1, 128>}, {transform_indices = @transform_5, window_bounds = array<i64: 1, 64, 128>}]} {
    %cst = arith.constant 0.000000e+00 : f32
    %0 = vector.broadcast %cst : f32 to vector<64x128xf32>
    %c0 = arith.constant 0 : index
    %c0_0 = arith.constant 0 : index
    %c0_1 = arith.constant 0 : index
    %c0_2 = arith.constant 0 : index
    %c0_3 = arith.constant 0 : index
    %1 = vector.load %arg1[%c0, %c0_0, %c0_1, %c0_2, %c0_3] : memref<1x4x9x9x3xbf16, #tpu.memory_space<vmem>>, vector<1x1x8x8x3xbf16>
    %2 = vector.shape_cast %1 : vector<1x1x8x8x3xbf16> to vector<8x8x3xbf16>
    %3 = vector.shape_cast %2 : vector<8x8x3xbf16> to vector<64x3xbf16>
    %c0_4 = arith.constant 0 : index
    %c0_5 = arith.constant 0 : index
    %c0_6 = arith.constant 0 : index
    %4 = vector.load %arg2[%c0_4, %c0_5, %c0_6] : memref<9x3x128xbf16, #tpu.memory_space<vmem>>, vector<1x3x128xbf16>
    %5 = vector.shape_cast %4 : vector<1x3x128xbf16> to vector<3x128xbf16>
    %cst_7 = arith.constant dense<0.000000e+00> : vector<64x128xf32>
    %6 = tpu.matmul %3, %5, %cst_7 {dimension_numbers = #tpu.dot_dimension_numbers<[1], [0], [0], [1], [0, 0, 1, 1], [], []>} : vector<64x3xbf16>, vector<3x128xbf16>, vector<64x128xf32> -> vector<64x128xf32>
    %7 = arith.addf %0, %6 : vector<64x128xf32>
    %c0_8 = arith.constant 0 : index
    %c1 = arith.constant 1 : index
    %c0_9 = arith.constant 0 : index
    %c0_10 = arith.constant 0 : index
    %c0_11 = arith.constant 0 : index
    %8 = vector.load %arg1[%c0_8, %c1, %c0_9, %c0_10, %c0_11] : memref<1x4x9x9x3xbf16, #tpu.memory_space<vmem>>, vector<1x1x8x8x3xbf16>
    %9 = vector.shape_cast %8 : vector<1x1x8x8x3xbf16> to vector<8x8x3xbf16>
    %10 = vector.shape_cast %9 : vector<8x8x3xbf16> to vector<64x3xbf16>
    %c1_12 = arith.constant 1 : index
    %c0_13 = arith.constant 0 : index
    %c0_14 = arith.constant 0 : index
    %11 = vector.load %arg2[%c1_12, %c0_13, %c0_14] : memref<9x3x128xbf16, #tpu.memory_space<vmem>>, vector<1x3x128xbf16>
    %12 = vector.shape_cast %11 : vector<1x3x128xbf16> to vector<3x128xbf16>
    %cst_15 = arith.constant dense<0.000000e+00> : vector<64x128xf32>
    %13 = tpu.matmul %10, %12, %cst_15 {dimension_numbers = #tpu.dot_dimension_numbers<[1], [0], [0], [1], [0, 0, 1, 1], [], []>} : vector<64x3xbf16>, vector<3x128xbf16>, vector<64x128xf32> -> vector<64x128xf32>
    %14 = arith.addf %7, %13 : vector<64x128xf32>
    %c0_16 = arith.constant 0 : index
    %c0_17 = arith.constant 0 : index
    %c0_18 = arith.constant 0 : index
    %c1_19 = arith.constant 1 : index
    %c0_20 = arith.constant 0 : index
    %15 = vector.load %arg1[%c0_16, %c0_17, %c0_18, %c1_19, %c0_20] : memref<1x4x9x9x3xbf16, #tpu.memory_space<vmem>>, vector<1x1x8x8x3xbf16>
    %16 = vector.shape_cast %15 : vector<1x1x8x8x3xbf16> to vector<8x8x3xbf16>
    %17 = vector.shape_cast %16 : vector<8x8x3xbf16> to vector<64x3xbf16>
    %c2 = arith.constant 2 : index
    %c0_21 = arith.constant 0 : index
    %c0_22 = arith.constant 0 : index
    %18 = vector.load %arg2[%c2, %c0_21, %c0_22] : memref<9x3x128xbf16, #tpu.memory_space<vmem>>, vector<1x3x128xbf16>
    %19 = vector.shape_cast %18 : vector<1x3x128xbf16> to vector<3x128xbf16>
    %cst_23 = arith.constant dense<0.000000e+00> : vector<64x128xf32>
    %20 = tpu.matmul %17, %19, %cst_23 {dimension_numbers = #tpu.dot_dimension_numbers<[1], [0], [0], [1], [0, 0, 1, 1], [], []>} : vector<64x3xbf16>, vector<3x128xbf16>, vector<64x128xf32> -> vector<64x128xf32>
    %21 = arith.addf %14, %20 : vector<64x128xf32>
    %c0_24 = arith.constant 0 : index
    %c2_25 = arith.constant 2 : index
    %c0_26 = arith.constant 0 : index
    %c0_27 = arith.constant 0 : index
    %c0_28 = arith.constant 0 : index
    %22 = vector.load %arg1[%c0_24, %c2_25, %c0_26, %c0_27, %c0_28] : memref<1x4x9x9x3xbf16, #tpu.memory_space<vmem>>, vector<1x1x8x8x3xbf16>
    %23 = vector.shape_cast %22 : vector<1x1x8x8x3xbf16> to vector<8x8x3xbf16>
    %24 = vector.shape_cast %23 : vector<8x8x3xbf16> to vector<64x3xbf16>
    %c3 = arith.constant 3 : index
    %c0_29 = arith.constant 0 : index
    %c0_30 = arith.constant 0 : index
    %25 = vector.load %arg2[%c3, %c0_29, %c0_30] : memref<9x3x128xbf16, #tpu.memory_space<vmem>>, vector<1x3x128xbf16>
    %26 = vector.shape_cast %25 : vector<1x3x128xbf16> to vector<3x128xbf16>
    %cst_31 = arith.constant dense<0.000000e+00> : vector<64x128xf32>
    %27 = tpu.matmul %24, %26, %cst_31 {dimension_numbers = #tpu.dot_dimension_numbers<[1], [0], [0], [1], [0, 0, 1, 1], [], []>} : vector<64x3xbf16>, vector<3x128xbf16>, vector<64x128xf32> -> vector<64x128xf32>
    %28 = arith.addf %21, %27 : vector<64x128xf32>
    %c0_32 = arith.constant 0 : index
    %c3_33 = arith.constant 3 : index
    %c0_34 = arith.constant 0 : index
    %c0_35 = arith.constant 0 : index
    %c0_36 = arith.constant 0 : index
    %29 = vector.load %arg1[%c0_32, %c3_33, %c0_34, %c0_35, %c0_36] : memref<1x4x9x9x3xbf16, #tpu.memory_space<vmem>>, vector<1x1x8x8x3xbf16>
    %30 = vector.shape_cast %29 : vector<1x1x8x8x3xbf16> to vector<8x8x3xbf16>
    %31 = vector.shape_cast %30 : vector<8x8x3xbf16> to vector<64x3xbf16>
    %c4 = arith.constant 4 : index
    %c0_37 = arith.constant 0 : index
    %c0_38 = arith.constant 0 : index
    %32 = vector.load %arg2[%c4, %c0_37, %c0_38] : memref<9x3x128xbf16, #tpu.memory_space<vmem>>, vector<1x3x128xbf16>
    %33 = vector.shape_cast %32 : vector<1x3x128xbf16> to vector<3x128xbf16>
    %cst_39 = arith.constant dense<0.000000e+00> : vector<64x128xf32>
    %34 = tpu.matmul %31, %33, %cst_39 {dimension_numbers = #tpu.dot_dimension_numbers<[1], [0], [0], [1], [0, 0, 1, 1], [], []>} : vector<64x3xbf16>, vector<3x128xbf16>, vector<64x128xf32> -> vector<64x128xf32>
    %35 = arith.addf %28, %34 : vector<64x128xf32>
    %c0_40 = arith.constant 0 : index
    %c2_41 = arith.constant 2 : index
    %c0_42 = arith.constant 0 : index
    %c1_43 = arith.constant 1 : index
    %c0_44 = arith.constant 0 : index
    %36 = vector.load %arg1[%c0_40, %c2_41, %c0_42, %c1_43, %c0_44] : memref<1x4x9x9x3xbf16, #tpu.memory_space<vmem>>, vector<1x1x8x8x3xbf16>
    %37 = vector.shape_cast %36 : vector<1x1x8x8x3xbf16> to vector<8x8x3xbf16>
    %38 = vector.shape_cast %37 : vector<8x8x3xbf16> to vector<64x3xbf16>
    %c5 = arith.constant 5 : index
    %c0_45 = arith.constant 0 : index
    %c0_46 = arith.constant 0 : index
    %39 = vector.load %arg2[%c5, %c0_45, %c0_46] : memref<9x3x128xbf16, #tpu.memory_space<vmem>>, vector<1x3x128xbf16>
    %40 = vector.shape_cast %39 : vector<1x3x128xbf16> to vector<3x128xbf16>
    %cst_47 = arith.constant dense<0.000000e+00> : vector<64x128xf32>
    %41 = tpu.matmul %38, %40, %cst_47 {dimension_numbers = #tpu.dot_dimension_numbers<[1], [0], [0], [1], [0, 0, 1, 1], [], []>} : vector<64x3xbf16>, vector<3x128xbf16>, vector<64x128xf32> -> vector<64x128xf32>
    %42 = arith.addf %35, %41 : vector<64x128xf32>
    %c0_48 = arith.constant 0 : index
    %c0_49 = arith.constant 0 : index
    %c1_50 = arith.constant 1 : index
    %c0_51 = arith.constant 0 : index
    %c0_52 = arith.constant 0 : index
    %43 = vector.load %arg1[%c0_48, %c0_49, %c1_50, %c0_51, %c0_52] : memref<1x4x9x9x3xbf16, #tpu.memory_space<vmem>>, vector<1x1x8x8x3xbf16>
    %44 = vector.shape_cast %43 : vector<1x1x8x8x3xbf16> to vector<8x8x3xbf16>
    %45 = vector.shape_cast %44 : vector<8x8x3xbf16> to vector<64x3xbf16>
    %c6 = arith.constant 6 : index
    %c0_53 = arith.constant 0 : index
    %c0_54 = arith.constant 0 : index
    %46 = vector.load %arg2[%c6, %c0_53, %c0_54] : memref<9x3x128xbf16, #tpu.memory_space<vmem>>, vector<1x3x128xbf16>
    %47 = vector.shape_cast %46 : vector<1x3x128xbf16> to vector<3x128xbf16>
    %cst_55 = arith.constant dense<0.000000e+00> : vector<64x128xf32>
    %48 = tpu.matmul %45, %47, %cst_55 {dimension_numbers = #tpu.dot_dimension_numbers<[1], [0], [0], [1], [0, 0, 1, 1], [], []>} : vector<64x3xbf16>, vector<3x128xbf16>, vector<64x128xf32> -> vector<64x128xf32>
    %49 = arith.addf %42, %48 : vector<64x128xf32>
    %c0_56 = arith.constant 0 : index
    %c1_57 = arith.constant 1 : index
    %c1_58 = arith.constant 1 : index
    %c0_59 = arith.constant 0 : index
    %c0_60 = arith.constant 0 : index
    %50 = vector.load %arg1[%c0_56, %c1_57, %c1_58, %c0_59, %c0_60] : memref<1x4x9x9x3xbf16, #tpu.memory_space<vmem>>, vector<1x1x8x8x3xbf16>
    %51 = vector.shape_cast %50 : vector<1x1x8x8x3xbf16> to vector<8x8x3xbf16>
    %52 = vector.shape_cast %51 : vector<8x8x3xbf16> to vector<64x3xbf16>
    %c7 = arith.constant 7 : index
    %c0_61 = arith.constant 0 : index
    %c0_62 = arith.constant 0 : index
    %53 = vector.load %arg2[%c7, %c0_61, %c0_62] : memref<9x3x128xbf16, #tpu.memory_space<vmem>>, vector<1x3x128xbf16>
    %54 = vector.shape_cast %53 : vector<1x3x128xbf16> to vector<3x128xbf16>
    %cst_63 = arith.constant dense<0.000000e+00> : vector<64x128xf32>
    %55 = tpu.matmul %52, %54, %cst_63 {dimension_numbers = #tpu.dot_dimension_numbers<[1], [0], [0], [1], [0, 0, 1, 1], [], []>} : vector<64x3xbf16>, vector<3x128xbf16>, vector<64x128xf32> -> vector<64x128xf32>
    %56 = arith.addf %49, %55 : vector<64x128xf32>
    %c0_64 = arith.constant 0 : index
    %c0_65 = arith.constant 0 : index
    %c1_66 = arith.constant 1 : index
    %c1_67 = arith.constant 1 : index
    %c0_68 = arith.constant 0 : index
    %57 = vector.load %arg1[%c0_64, %c0_65, %c1_66, %c1_67, %c0_68] : memref<1x4x9x9x3xbf16, #tpu.memory_space<vmem>>, vector<1x1x8x8x3xbf16>
    %58 = vector.shape_cast %57 : vector<1x1x8x8x3xbf16> to vector<8x8x3xbf16>
    %59 = vector.shape_cast %58 : vector<8x8x3xbf16> to vector<64x3xbf16>
    %c8 = arith.constant 8 : index
    %c0_69 = arith.constant 0 : index
    %c0_70 = arith.constant 0 : index
    %60 = vector.load %arg2[%c8, %c0_69, %c0_70] : memref<9x3x128xbf16, #tpu.memory_space<vmem>>, vector<1x3x128xbf16>
    %61 = vector.shape_cast %60 : vector<1x3x128xbf16> to vector<3x128xbf16>
    %cst_71 = arith.constant dense<0.000000e+00> : vector<64x128xf32>
    %62 = tpu.matmul %59, %61, %cst_71 {dimension_numbers = #tpu.dot_dimension_numbers<[1], [0], [0], [1], [0, 0, 1, 1], [], []>} : vector<64x3xbf16>, vector<3x128xbf16>, vector<64x128xf32> -> vector<64x128xf32>
    %63 = arith.addf %56, %62 : vector<64x128xf32>
    %c0_72 = arith.constant 0 : index
    %c0_73 = arith.constant 0 : index
    %64 = vector.load %arg3[%c0_72, %c0_73] : memref<1x128xf32, #tpu.memory_space<vmem>>, vector<1x128xf32>
    %65 = vector.broadcast %64 : vector<1x128xf32> to vector<64x128xf32>
    %66 = arith.addf %63, %65 : vector<64x128xf32>
    %cst_74 = arith.constant dense<0.000000e+00> : vector<64xf32>
    %67 = vector.multi_reduction <add>, %66, %cst_74 [1] : vector<64x128xf32> to vector<64xf32>
    %68 = vector.shape_cast %67 : vector<64xf32> to vector<64x1xf32>
    %cst_75 = arith.constant dense<0.000000e+00> : vector<1xf32>
    %69 = vector.multi_reduction <add>, %68, %cst_75 [0] : vector<64x1xf32> to vector<1xf32>
    %70 = vector.shape_cast %69 : vector<1xf32> to vector<1x1xf32>
    %71 = arith.mulf %66, %66 : vector<64x128xf32>
    %cst_76 = arith.constant dense<0.000000e+00> : vector<64xf32>
    %72 = vector.multi_reduction <add>, %71, %cst_76 [1] : vector<64x128xf32> to vector<64xf32>
    %73 = vector.shape_cast %72 : vector<64xf32> to vector<64x1xf32>
    %cst_77 = arith.constant dense<0.000000e+00> : vector<1xf32>
    %74 = vector.multi_reduction <add>, %73, %cst_77 [0] : vector<64x1xf32> to vector<1xf32>
    %75 = vector.shape_cast %74 : vector<1xf32> to vector<1x1xf32>
    %cst_78 = arith.constant 2.048000e+03 : f32
    %76 = vector.broadcast %cst_78 : f32 to vector<1x1xf32>
    %77 = arith.divf %70, %76 : vector<1x1xf32>
    %cst_79 = arith.constant 2.048000e+03 : f32
    %78 = vector.broadcast %cst_79 : f32 to vector<1x1xf32>
    %79 = arith.mulf %78, %77 : vector<1x1xf32>
    %80 = arith.mulf %79, %77 : vector<1x1xf32>
    %81 = arith.subf %75, %80 : vector<1x1xf32>
    %cst_80 = arith.constant 2.047000e+03 : f32
    %82 = vector.broadcast %cst_80 : f32 to vector<1x1xf32>
    %83 = arith.divf %81, %82 : vector<1x1xf32>
    %cst_81 = arith.constant 0.000000e+00 : f32
    %84 = vector.broadcast %cst_81 : f32 to vector<1x1xf32>
    %85 = arith.maximumf %83, %84 : vector<1x1xf32>
    %86 = math.sqrt %85 : vector<1x1xf32>
    %cst_82 = arith.constant 9.99999974E-6 : f32
    %87 = vector.broadcast %cst_82 : f32 to vector<1x1xf32>
    %88 = arith.addf %86, %87 : vector<1x1xf32>
    %89 = tpu.reciprocal %88 {approx = true} : vector<1x1xf32> -> vector<1x1xf32>
    %90 = vector.broadcast %77 : vector<1x1xf32> to vector<64x128xf32>
    %91 = arith.subf %66, %90 : vector<64x128xf32>
    %92 = vector.broadcast %89 : vector<1x1xf32> to vector<64x128xf32>
    %93 = arith.mulf %91, %92 : vector<64x128xf32>
    %c0_83 = arith.constant 0 : index
    %c0_84 = arith.constant 0 : index
    %94 = vector.load %arg4[%c0_83, %c0_84] : memref<1x128xf32, #tpu.memory_space<vmem>>, vector<1x128xf32>
    %95 = vector.broadcast %94 : vector<1x128xf32> to vector<64x128xf32>
    %96 = arith.mulf %93, %95 : vector<64x128xf32>
    %c0_85 = arith.constant 0 : index
    %c0_86 = arith.constant 0 : index
    %97 = vector.load %arg5[%c0_85, %c0_86] : memref<1x128xf32, #tpu.memory_space<vmem>>, vector<1x128xf32>
    %98 = vector.broadcast %97 : vector<1x128xf32> to vector<64x128xf32>
    %99 = arith.addf %96, %98 : vector<64x128xf32>
    %cst_87 = arith.constant 0.000000e+00 : f32
    %100 = vector.broadcast %cst_87 : f32 to vector<64x128xf32>
    %101 = arith.maximumf %99, %100 : vector<64x128xf32>
    %102 = arith.truncf %101 : vector<64x128xf32> to vector<64x128xbf16>
    %103 = vector.shape_cast %102 : vector<64x128xbf16> to vector<1x64x128xbf16>
    %c0_88 = arith.constant 0 : index
    %c0_89 = arith.constant 0 : index
    %c0_90 = arith.constant 0 : index
    %104 = vector.load %arg6[%c0_88, %c0_89, %c0_90] : memref<1x64x128xbf16, #tpu.memory_space<vmem>>, vector<1x64x128xbf16>
    tpu.vector_store %arg6[%c0_88, %c0_89, %c0_90], %103 {strides = array<i32>} : memref<1x64x128xbf16, #tpu.memory_space<vmem>>, vector<1x64x128xbf16>,
    return
  }
  func.func @transform_0(%arg0: i32) -> (i32, i32, i32, i32, i32) {
    %c0_i32 = arith.constant 0 : i32
    %c0_i32_0 = arith.constant 0 : i32
    %c0_i32_1 = arith.constant 0 : i32
    %c0_i32_2 = arith.constant 0 : i32
    %c0_i32_3 = arith.constant 0 : i32
    return %arg0, %c0_i32, %c0_i32_0, %c0_i32_1, %c0_i32_2 : i32, i32, i32, i32, i32
  }
  func.func @transform_1(%arg0: i32) -> (i32, i32, i32) {
    %c0_i32 = arith.constant 0 : i32
    %c0_i32_0 = arith.constant 0 : i32
    %c0_i32_1 = arith.constant 0 : i32
    %c0_i32_2 = arith.constant 0 : i32
    return %c0_i32, %c0_i32_0, %c0_i32_1 : i32, i32, i32
  }
  func.func @transform_2(%arg0: i32) -> (i32, i32) {
    %c0_i32 = arith.constant 0 : i32
    %c0_i32_0 = arith.constant 0 : i32
    %c0_i32_1 = arith.constant 0 : i32
    return %c0_i32, %c0_i32_0 : i32, i32
  }
  func.func @transform_3(%arg0: i32) -> (i32, i32) {
    %c0_i32 = arith.constant 0 : i32
    %c0_i32_0 = arith.constant 0 : i32
    %c0_i32_1 = arith.constant 0 : i32
    return %c0_i32, %c0_i32_0 : i32, i32
  }
  func.func @transform_4(%arg0: i32) -> (i32, i32) {
    %c0_i32 = arith.constant 0 : i32
    %c0_i32_0 = arith.constant 0 : i32
    %c0_i32_1 = arith.constant 0 : i32
    return %c0_i32, %c0_i32_0 : i32, i32
  }
  func.func @transform_5(%arg0: i32) -> (i32, i32, i32) {
    %c0_i32 = arith.constant 0 : i32
    %c0_i32_0 = arith.constant 0 : i32
    %c0_i32_1 = arith.constant 0 : i32
    return %arg0, %c0_i32, %c0_i32_0 : i32, i32, i32
  }
}

module attributes {stable_mosaic.version = 11 : i64} {
  func.func @_conv_ln_relu_kernel(%arg0: i32, %arg1: memref<1x4x5x5x128xbf16, #tpu.memory_space<vmem>>, %arg2: memref<9x128x128xbf16, #tpu.memory_space<vmem>>, %arg3: memref<1x128xf32, #tpu.memory_space<vmem>>, %arg4: memref<1x128xf32, #tpu.memory_space<vmem>>, %arg5: memref<1x128xf32, #tpu.memory_space<vmem>>, %arg6: memref<1x16x128xbf16, #tpu.memory_space<vmem>>) attributes {dimension_semantics = [#tpu.dimension_semantics<parallel>], iteration_bounds = array<i64: 2>, scalar_prefetch = 0 : i64, scratch_operands = 0 : i64, tpu.core_type = #tpu.core_type<tc>, window_params = [{transform_indices = @transform_0, window_bounds = array<i64: 1, 4, 5, 5, 128>}, {pipeline_mode = #tpu.pipeline_mode<synchronous>, transform_indices = @transform_1, window_bounds = array<i64: 9, 128, 128>}, {pipeline_mode = #tpu.pipeline_mode<synchronous>, transform_indices = @transform_2, window_bounds = array<i64: 1, 128>}, {pipeline_mode = #tpu.pipeline_mode<synchronous>, transform_indices = @transform_3, window_bounds = array<i64: 1, 128>}, {pipeline_mode = #tpu.pipeline_mode<synchronous>, transform_indices = @transform_4, window_bounds = array<i64: 1, 128>}, {transform_indices = @transform_5, window_bounds = array<i64: 1, 16, 128>}]} {
    %cst = arith.constant 0.000000e+00 : f32
    %0 = vector.broadcast %cst : f32 to vector<16x128xf32>
    %c0 = arith.constant 0 : index
    %c0_0 = arith.constant 0 : index
    %c0_1 = arith.constant 0 : index
    %c0_2 = arith.constant 0 : index
    %c0_3 = arith.constant 0 : index
    %1 = vector.load %arg1[%c0, %c0_0, %c0_1, %c0_2, %c0_3] : memref<1x4x5x5x128xbf16, #tpu.memory_space<vmem>>, vector<1x1x4x4x128xbf16>
    %2 = vector.shape_cast %1 : vector<1x1x4x4x128xbf16> to vector<4x4x128xbf16>
    %3 = vector.shape_cast %2 : vector<4x4x128xbf16> to vector<16x128xbf16>
    %c0_4 = arith.constant 0 : index
    %c0_5 = arith.constant 0 : index
    %c0_6 = arith.constant 0 : index
    %4 = vector.load %arg2[%c0_4, %c0_5, %c0_6] : memref<9x128x128xbf16, #tpu.memory_space<vmem>>, vector<1x128x128xbf16>
    %5 = vector.shape_cast %4 : vector<1x128x128xbf16> to vector<128x128xbf16>
    %cst_7 = arith.constant dense<0.000000e+00> : vector<16x128xf32>
    %6 = tpu.matmul %3, %5, %cst_7 {dimension_numbers = #tpu.dot_dimension_numbers<[1], [0], [0], [1], [0, 0, 1, 1], [], []>} : vector<16x128xbf16>, vector<128x128xbf16>, vector<16x128xf32> -> vector<16x128xf32>
    %7 = arith.addf %0, %6 : vector<16x128xf32>
    %c0_8 = arith.constant 0 : index
    %c1 = arith.constant 1 : index
    %c0_9 = arith.constant 0 : index
    %c0_10 = arith.constant 0 : index
    %c0_11 = arith.constant 0 : index
    %8 = vector.load %arg1[%c0_8, %c1, %c0_9, %c0_10, %c0_11] : memref<1x4x5x5x128xbf16, #tpu.memory_space<vmem>>, vector<1x1x4x4x128xbf16>
    %9 = vector.shape_cast %8 : vector<1x1x4x4x128xbf16> to vector<4x4x128xbf16>
    %10 = vector.shape_cast %9 : vector<4x4x128xbf16> to vector<16x128xbf16>
    %c1_12 = arith.constant 1 : index
    %c0_13 = arith.constant 0 : index
    %c0_14 = arith.constant 0 : index
    %11 = vector.load %arg2[%c1_12, %c0_13, %c0_14] : memref<9x128x128xbf16, #tpu.memory_space<vmem>>, vector<1x128x128xbf16>
    %12 = vector.shape_cast %11 : vector<1x128x128xbf16> to vector<128x128xbf16>
    %cst_15 = arith.constant dense<0.000000e+00> : vector<16x128xf32>
    %13 = tpu.matmul %10, %12, %cst_15 {dimension_numbers = #tpu.dot_dimension_numbers<[1], [0], [0], [1], [0, 0, 1, 1], [], []>} : vector<16x128xbf16>, vector<128x128xbf16>, vector<16x128xf32> -> vector<16x128xf32>
    %14 = arith.addf %7, %13 : vector<16x128xf32>
    %c0_16 = arith.constant 0 : index
    %c0_17 = arith.constant 0 : index
    %c0_18 = arith.constant 0 : index
    %c1_19 = arith.constant 1 : index
    %c0_20 = arith.constant 0 : index
    %15 = vector.load %arg1[%c0_16, %c0_17, %c0_18, %c1_19, %c0_20] : memref<1x4x5x5x128xbf16, #tpu.memory_space<vmem>>, vector<1x1x4x4x128xbf16>
    %16 = vector.shape_cast %15 : vector<1x1x4x4x128xbf16> to vector<4x4x128xbf16>
    %17 = vector.shape_cast %16 : vector<4x4x128xbf16> to vector<16x128xbf16>
    %c2 = arith.constant 2 : index
    %c0_21 = arith.constant 0 : index
    %c0_22 = arith.constant 0 : index
    %18 = vector.load %arg2[%c2, %c0_21, %c0_22] : memref<9x128x128xbf16, #tpu.memory_space<vmem>>, vector<1x128x128xbf16>
    %19 = vector.shape_cast %18 : vector<1x128x128xbf16> to vector<128x128xbf16>
    %cst_23 = arith.constant dense<0.000000e+00> : vector<16x128xf32>
    %20 = tpu.matmul %17, %19, %cst_23 {dimension_numbers = #tpu.dot_dimension_numbers<[1], [0], [0], [1], [0, 0, 1, 1], [], []>} : vector<16x128xbf16>, vector<128x128xbf16>, vector<16x128xf32> -> vector<16x128xf32>
    %21 = arith.addf %14, %20 : vector<16x128xf32>
    %c0_24 = arith.constant 0 : index
    %c2_25 = arith.constant 2 : index
    %c0_26 = arith.constant 0 : index
    %c0_27 = arith.constant 0 : index
    %c0_28 = arith.constant 0 : index
    %22 = vector.load %arg1[%c0_24, %c2_25, %c0_26, %c0_27, %c0_28] : memref<1x4x5x5x128xbf16, #tpu.memory_space<vmem>>, vector<1x1x4x4x128xbf16>
    %23 = vector.shape_cast %22 : vector<1x1x4x4x128xbf16> to vector<4x4x128xbf16>
    %24 = vector.shape_cast %23 : vector<4x4x128xbf16> to vector<16x128xbf16>
    %c3 = arith.constant 3 : index
    %c0_29 = arith.constant 0 : index
    %c0_30 = arith.constant 0 : index
    %25 = vector.load %arg2[%c3, %c0_29, %c0_30] : memref<9x128x128xbf16, #tpu.memory_space<vmem>>, vector<1x128x128xbf16>
    %26 = vector.shape_cast %25 : vector<1x128x128xbf16> to vector<128x128xbf16>
    %cst_31 = arith.constant dense<0.000000e+00> : vector<16x128xf32>
    %27 = tpu.matmul %24, %26, %cst_31 {dimension_numbers = #tpu.dot_dimension_numbers<[1], [0], [0], [1], [0, 0, 1, 1], [], []>} : vector<16x128xbf16>, vector<128x128xbf16>, vector<16x128xf32> -> vector<16x128xf32>
    %28 = arith.addf %21, %27 : vector<16x128xf32>
    %c0_32 = arith.constant 0 : index
    %c3_33 = arith.constant 3 : index
    %c0_34 = arith.constant 0 : index
    %c0_35 = arith.constant 0 : index
    %c0_36 = arith.constant 0 : index
    %29 = vector.load %arg1[%c0_32, %c3_33, %c0_34, %c0_35, %c0_36] : memref<1x4x5x5x128xbf16, #tpu.memory_space<vmem>>, vector<1x1x4x4x128xbf16>
    %30 = vector.shape_cast %29 : vector<1x1x4x4x128xbf16> to vector<4x4x128xbf16>
    %31 = vector.shape_cast %30 : vector<4x4x128xbf16> to vector<16x128xbf16>
    %c4 = arith.constant 4 : index
    %c0_37 = arith.constant 0 : index
    %c0_38 = arith.constant 0 : index
    %32 = vector.load %arg2[%c4, %c0_37, %c0_38] : memref<9x128x128xbf16, #tpu.memory_space<vmem>>, vector<1x128x128xbf16>
    %33 = vector.shape_cast %32 : vector<1x128x128xbf16> to vector<128x128xbf16>
    %cst_39 = arith.constant dense<0.000000e+00> : vector<16x128xf32>
    %34 = tpu.matmul %31, %33, %cst_39 {dimension_numbers = #tpu.dot_dimension_numbers<[1], [0], [0], [1], [0, 0, 1, 1], [], []>} : vector<16x128xbf16>, vector<128x128xbf16>, vector<16x128xf32> -> vector<16x128xf32>
    %35 = arith.addf %28, %34 : vector<16x128xf32>
    %c0_40 = arith.constant 0 : index
    %c2_41 = arith.constant 2 : index
    %c0_42 = arith.constant 0 : index
    %c1_43 = arith.constant 1 : index
    %c0_44 = arith.constant 0 : index
    %36 = vector.load %arg1[%c0_40, %c2_41, %c0_42, %c1_43, %c0_44] : memref<1x4x5x5x128xbf16, #tpu.memory_space<vmem>>, vector<1x1x4x4x128xbf16>
    %37 = vector.shape_cast %36 : vector<1x1x4x4x128xbf16> to vector<4x4x128xbf16>
    %38 = vector.shape_cast %37 : vector<4x4x128xbf16> to vector<16x128xbf16>
    %c5 = arith.constant 5 : index
    %c0_45 = arith.constant 0 : index
    %c0_46 = arith.constant 0 : index
    %39 = vector.load %arg2[%c5, %c0_45, %c0_46] : memref<9x128x128xbf16, #tpu.memory_space<vmem>>, vector<1x128x128xbf16>
    %40 = vector.shape_cast %39 : vector<1x128x128xbf16> to vector<128x128xbf16>
    %cst_47 = arith.constant dense<0.000000e+00> : vector<16x128xf32>
    %41 = tpu.matmul %38, %40, %cst_47 {dimension_numbers = #tpu.dot_dimension_numbers<[1], [0], [0], [1], [0, 0, 1, 1], [], []>} : vector<16x128xbf16>, vector<128x128xbf16>, vector<16x128xf32> -> vector<16x128xf32>
    %42 = arith.addf %35, %41 : vector<16x128xf32>
    %c0_48 = arith.constant 0 : index
    %c0_49 = arith.constant 0 : index
    %c1_50 = arith.constant 1 : index
    %c0_51 = arith.constant 0 : index
    %c0_52 = arith.constant 0 : index
    %43 = vector.load %arg1[%c0_48, %c0_49, %c1_50, %c0_51, %c0_52] : memref<1x4x5x5x128xbf16, #tpu.memory_space<vmem>>, vector<1x1x4x4x128xbf16>
    %44 = vector.shape_cast %43 : vector<1x1x4x4x128xbf16> to vector<4x4x128xbf16>
    %45 = vector.shape_cast %44 : vector<4x4x128xbf16> to vector<16x128xbf16>
    %c6 = arith.constant 6 : index
    %c0_53 = arith.constant 0 : index
    %c0_54 = arith.constant 0 : index
    %46 = vector.load %arg2[%c6, %c0_53, %c0_54] : memref<9x128x128xbf16, #tpu.memory_space<vmem>>, vector<1x128x128xbf16>
    %47 = vector.shape_cast %46 : vector<1x128x128xbf16> to vector<128x128xbf16>
    %cst_55 = arith.constant dense<0.000000e+00> : vector<16x128xf32>
    %48 = tpu.matmul %45, %47, %cst_55 {dimension_numbers = #tpu.dot_dimension_numbers<[1], [0], [0], [1], [0, 0, 1, 1], [], []>} : vector<16x128xbf16>, vector<128x128xbf16>, vector<16x128xf32> -> vector<16x128xf32>
    %49 = arith.addf %42, %48 : vector<16x128xf32>
    %c0_56 = arith.constant 0 : index
    %c1_57 = arith.constant 1 : index
    %c1_58 = arith.constant 1 : index
    %c0_59 = arith.constant 0 : index
    %c0_60 = arith.constant 0 : index
    %50 = vector.load %arg1[%c0_56, %c1_57, %c1_58, %c0_59, %c0_60] : memref<1x4x5x5x128xbf16, #tpu.memory_space<vmem>>, vector<1x1x4x4x128xbf16>
    %51 = vector.shape_cast %50 : vector<1x1x4x4x128xbf16> to vector<4x4x128xbf16>
    %52 = vector.shape_cast %51 : vector<4x4x128xbf16> to vector<16x128xbf16>
    %c7 = arith.constant 7 : index
    %c0_61 = arith.constant 0 : index
    %c0_62 = arith.constant 0 : index
    %53 = vector.load %arg2[%c7, %c0_61, %c0_62] : memref<9x128x128xbf16, #tpu.memory_space<vmem>>, vector<1x128x128xbf16>
    %54 = vector.shape_cast %53 : vector<1x128x128xbf16> to vector<128x128xbf16>
    %cst_63 = arith.constant dense<0.000000e+00> : vector<16x128xf32>
    %55 = tpu.matmul %52, %54, %cst_63 {dimension_numbers = #tpu.dot_dimension_numbers<[1], [0], [0], [1], [0, 0, 1, 1], [], []>} : vector<16x128xbf16>, vector<128x128xbf16>, vector<16x128xf32> -> vector<16x128xf32>
    %56 = arith.addf %49, %55 : vector<16x128xf32>
    %c0_64 = arith.constant 0 : index
    %c0_65 = arith.constant 0 : index
    %c1_66 = arith.constant 1 : index
    %c1_67 = arith.constant 1 : index
    %c0_68 = arith.constant 0 : index
    %57 = vector.load %arg1[%c0_64, %c0_65, %c1_66, %c1_67, %c0_68] : memref<1x4x5x5x128xbf16, #tpu.memory_space<vmem>>, vector<1x1x4x4x128xbf16>
    %58 = vector.shape_cast %57 : vector<1x1x4x4x128xbf16> to vector<4x4x128xbf16>
    %59 = vector.shape_cast %58 : vector<4x4x128xbf16> to vector<16x128xbf16>
    %c8 = arith.constant 8 : index
    %c0_69 = arith.constant 0 : index
    %c0_70 = arith.constant 0 : index
    %60 = vector.load %arg2[%c8, %c0_69, %c0_70] : memref<9x128x128xbf16, #tpu.memory_space<vmem>>, vector<1x128x128xbf16>
    %61 = vector.shape_cast %60 : vector<1x128x128xbf16> to vector<128x128xbf16>
    %cst_71 = arith.constant dense<0.000000e+00> : vector<16x128xf32>
    %62 = tpu.matmul %59, %61, %cst_71 {dimension_numbers = #tpu.dot_dimension_numbers<[1], [0], [0], [1], [0, 0, 1, 1], [], []>} : vector<16x128xbf16>, vector<128x128xbf16>, vector<16x128xf32> -> vector<16x128xf32>
    %63 = arith.addf %56, %62 : vector<16x128xf32>
    %c0_72 = arith.constant 0 : index
    %c0_73 = arith.constant 0 : index
    %64 = vector.load %arg3[%c0_72, %c0_73] : memref<1x128xf32, #tpu.memory_space<vmem>>, vector<1x128xf32>
    %65 = vector.broadcast %64 : vector<1x128xf32> to vector<16x128xf32>
    %66 = arith.addf %63, %65 : vector<16x128xf32>
    %cst_74 = arith.constant dense<0.000000e+00> : vector<16xf32>
    %67 = vector.multi_reduction <add>, %66, %cst_74 [1] : vector<16x128xf32> to vector<16xf32>
    %68 = vector.shape_cast %67 : vector<16xf32> to vector<16x1xf32>
    %cst_75 = arith.constant dense<0.000000e+00> : vector<1xf32>
    %69 = vector.multi_reduction <add>, %68, %cst_75 [0] : vector<16x1xf32> to vector<1xf32>
    %70 = vector.shape_cast %69 : vector<1xf32> to vector<1x1xf32>
    %71 = arith.mulf %66, %66 : vector<16x128xf32>
    %cst_76 = arith.constant dense<0.000000e+00> : vector<16xf32>
    %72 = vector.multi_reduction <add>, %71, %cst_76 [1] : vector<16x128xf32> to vector<16xf32>
    %73 = vector.shape_cast %72 : vector<16xf32> to vector<16x1xf32>
    %cst_77 = arith.constant dense<0.000000e+00> : vector<1xf32>
    %74 = vector.multi_reduction <add>, %73, %cst_77 [0] : vector<16x1xf32> to vector<1xf32>
    %75 = vector.shape_cast %74 : vector<1xf32> to vector<1x1xf32>
    %cst_78 = arith.constant 1.024000e+03 : f32
    %76 = vector.broadcast %cst_78 : f32 to vector<1x1xf32>
    %77 = arith.divf %70, %76 : vector<1x1xf32>
    %cst_79 = arith.constant 1.024000e+03 : f32
    %78 = vector.broadcast %cst_79 : f32 to vector<1x1xf32>
    %79 = arith.mulf %78, %77 : vector<1x1xf32>
    %80 = arith.mulf %79, %77 : vector<1x1xf32>
    %81 = arith.subf %75, %80 : vector<1x1xf32>
    %cst_80 = arith.constant 1.023000e+03 : f32
    %82 = vector.broadcast %cst_80 : f32 to vector<1x1xf32>
    %83 = arith.divf %81, %82 : vector<1x1xf32>
    %cst_81 = arith.constant 0.000000e+00 : f32
    %84 = vector.broadcast %cst_81 : f32 to vector<1x1xf32>
    %85 = arith.maximumf %83, %84 : vector<1x1xf32>
    %86 = math.sqrt %85 : vector<1x1xf32>
    %cst_82 = arith.constant 9.99999974E-6 : f32
    %87 = vector.broadcast %cst_82 : f32 to vector<1x1xf32>
    %88 = arith.addf %86, %87 : vector<1x1xf32>
    %89 = tpu.reciprocal %88 {approx = true} : vector<1x1xf32> -> vector<1x1xf32>
    %90 = vector.broadcast %77 : vector<1x1xf32> to vector<16x128xf32>
    %91 = arith.subf %66, %90 : vector<16x128xf32>
    %92 = vector.broadcast %89 : vector<1x1xf32> to vector<16x128xf32>
    %93 = arith.mulf %91, %92 : vector<16x128xf32>
    %c0_83 = arith.constant 0 : index
    %c0_84 = arith.constant 0 : index
    %94 = vector.load %arg4[%c0_83, %c0_84] : memref<1x128xf32, #tpu.memory_space<vmem>>, vector<1x128xf32>
    %95 = vector.broadcast %94 : vector<1x128xf32> to vector<16x128xf32>
    %96 = arith.mulf %93, %95 : vector<16x128xf32>
    %c0_85 = arith.constant 0 : index
    %c0_86 = arith.constant 0 : index
    %97 = vector.load %arg5[%c0_85, %c0_86] : memref<1x128xf32, #tpu.memory_space<vmem>>, vector<1x128xf32>
    %98 = vector.broadcast %97 : vector<1x128xf32> to vector<16x128xf32>
    %99 = arith.addf %96, %98 : vector<16x128xf32>
    %cst_87 = arith.constant 0.000000e+00 : f32
    %100 = vector.broadcast %cst_87 : f32 to vector<16x128xf32>
    %101 = arith.maximumf %99, %100 : vector<16x128xf32>
    %102 = arith.truncf %101 : vector<16x128xf32> to vector<16x128xbf16>
    %103 = vector.shape_cast %102 : vector<16x128xbf16> to vector<1x16x128xbf16>
    %c0_88 = arith.constant 0 : index
    %c0_89 = arith.constant 0 : index
    %c0_90 = arith.constant 0 : index
    %104 = vector.load %arg6[%c0_88, %c0_89, %c0_90] : memref<1x16x128xbf16, #tpu.memory_space<vmem>>, vector<1x16x128xbf16>
    tpu.vector_store %arg6[%c0_88, %c0_89, %c0_90], %103 {strides = array<i32>} : memref<1x16x128xbf16, #tpu.memory_space<vmem>>, vector<1x16x128xbf16>,
    return
  }
  func.func @transform_0(%arg0: i32) -> (i32, i32, i32, i32, i32) {
    %c0_i32 = arith.constant 0 : i32
    %c0_i32_0 = arith.constant 0 : i32
    %c0_i32_1 = arith.constant 0 : i32
    %c0_i32_2 = arith.constant 0 : i32
    %c0_i32_3 = arith.constant 0 : i32
    return %arg0, %c0_i32, %c0_i32_0, %c0_i32_1, %c0_i32_2 : i32, i32, i32, i32, i32
  }
  func.func @transform_1(%arg0: i32) -> (i32, i32, i32) {
    %c0_i32 = arith.constant 0 : i32
    %c0_i32_0 = arith.constant 0 : i32
    %c0_i32_1 = arith.constant 0 : i32
    %c0_i32_2 = arith.constant 0 : i32
    return %c0_i32, %c0_i32_0, %c0_i32_1 : i32, i32, i32
  }
  func.func @transform_2(%arg0: i32) -> (i32, i32) {
    %c0_i32 = arith.constant 0 : i32
    %c0_i32_0 = arith.constant 0 : i32
    %c0_i32_1 = arith.constant 0 : i32
    return %c0_i32, %c0_i32_0 : i32, i32
  }
  func.func @transform_3(%arg0: i32) -> (i32, i32) {
    %c0_i32 = arith.constant 0 : i32
    %c0_i32_0 = arith.constant 0 : i32
    %c0_i32_1 = arith.constant 0 : i32
    return %c0_i32, %c0_i32_0 : i32, i32
  }
  func.func @transform_4(%arg0: i32) -> (i32, i32) {
    %c0_i32 = arith.constant 0 : i32
    %c0_i32_0 = arith.constant 0 : i32
    %c0_i32_1 = arith.constant 0 : i32
    return %c0_i32, %c0_i32_0 : i32, i32
  }
  func.func @transform_5(%arg0: i32) -> (i32, i32, i32) {
    %c0_i32 = arith.constant 0 : i32
    %c0_i32_0 = arith.constant 0 : i32
    %c0_i32_1 = arith.constant 0 : i32
    return %arg0, %c0_i32, %c0_i32_0 : i32, i32, i32
  }
}

</mosaic_0001>

<bundles_post_ra>
// kernel: content_encoder.2
= control target key start
LH: loop header
LB: loop body
LE: loop exit
PB: predicated region body
PF: predicated region fallthrough
CT: control target
= control target key end

     0   :  { %s1864_s18 = smov 0   ;;  %s2236_s0 = inlined_call_operand.vmem [shape: bf16[2,4,9,9,3], index: 0, kind: input, shape index: {}]   ;;  %s2237_s1 = inlined_call_operand.vmem [shape: bf16[9,3,128], index: 1, kind: input, shape index: {}]   ;;  %s2238_s2 = inlined_call_operand.vmem [shape: f32[1,128], index: 2, kind: input, shape index: {}]   ;;  %s2239_s3 = inlined_call_operand.vmem [shape: f32[1,128], index: 3, kind: input, shape index: {}]   ;;  %s2240_s4 = inlined_call_operand.vmem [shape: f32[1,128], index: 4, kind: input, shape index: {}]   ;;  %s2241_s5 = inlined_call_operand.vmem [shape: bf16[2,64,128], index: 5, kind: output, shape index: {}]  }
   0x1 LB: > { %s1527_s19 = sadd.s32 4294967295, %s1829_s18   ;;  %p1531_p0 = scmp.ge.s32.totalorder %s1829_s18, 1  ;;  %s1829_s18 = sphi %s1864_s18, %s15_s18  }
   0x2   : > { %p187_p1 = scmp.lt.s32.totalorder %s1829_s18, 3 }
   0x4   : > { %p188_p2 = pnand %p1531_p0, %p187_p1 }
   0x5   : > { %p215_p3 = scmp.lt.s32.totalorder (!%p188_p2), %s1527_s19, 1 }
   0x6   : > { %191 = sbr.rel (%p188_p2) target bundleno = 486 (0x1e6), region = 40 }
   0xb   : > { %v1543_v0 = vld [vmem:[%s2237_s1 + $0x2] sm:$0x3]  ;;  %vm279_vm0 = vcmask 1040384   ;;  %vm280_vm1 = vcmask 1041408   ;;  %v1831_v1 = vmov 65535   ;;  %s2245_s19 = smov (!%p215_p3, %s1527_s19), 1 }
   0xc   : > { %v281_v2 = vsel %vm279_vm0, 4294967295, %v1831_v1  ;;  %v1584_v3 = vld [vmem:[%s2237_s1 + $0x4] sm:$0x3]  ;;  %v1597_v4 = vld [vmem:[%s2237_s1 + $0x6] sm:$0x3]  ;;  %s1800_s30 = smul.u32 288, %s2245_s19 }
   0xd   : > { %v1881_v5 = vsel %vm280_vm1, %v281_v2, 0  ;;  %v234_v6 = vld [vmem:[%s2237_s1] sm:$0x3]  ;;  %v1626_v7 = vld [vmem:[%s2237_s1 + $0x8] sm:$0x3]  ;;  %vm266_vm2 = vcmask 23552  }
   0xe   : > { %v284_v8 = vand.u32 %v1543_v0, %v1881_v5  ;;  %v537_v9 = vand.u32 %v1584_v3, %v1881_v5  ;;  %v620_v10 = vand.u32 %v1597_v4, %v1881_v5  ;;  %v348_v11 = vand.u32 %v1881_v5, %v234_v6  ;;  %v1676_v13 = vld [vmem:[%s2237_s1 + $0xc] sm:$0x3]  ;;  %v1705_v14 = vld [vmem:[%s2237_s1 + $0xe] sm:$0x3]  ;;  %v1663_v15 = vld [vmem:[%s2237_s1 + $0xa] sm:$0x3]  ;;  %s1909_s14 = scalar_lea.vmem %s2236_s0, %s1800_s30 }
   0xf   : > { %v703_v12 = vand.u32 %v1626_v7, %v1881_v5  ;;  %v1742_v16 = vld [vmem:[%s2237_s1 + $0x10] sm:$0x3]  ;;  %v1550_v17 = vld [vmem:[%s1909_s14 + $0x58] sm:$0xf]  ;;  %v1755_v18 = vld [vmem:[%s1909_s14 + $0x5c] sm:$0xf0]  ;;  %v980_v24 = vand.u32 %v1676_v13, %v1881_v5  ;;  %v1063_v29 = vand.u32 %v1705_v14, %v1881_v5  ;;  %v897_v30 = vand.u32 %v1663_v15, %v1881_v5 }
  0x10   : > { %1797 = vmatpush.bf16.msra.mxu1 %v284_v8  ;;  %1798 = vmatpush.bf16.msra.mxu2 %v284_v8  ;;  %v1554_v19 = vld [vmem:[%s1909_s14 + $0x68] sm:$0xf]  ;;  %v1551_v20 = vor.u32 %v1755_v18, %v1550_v17  ;;  %v1756_v21 = vld [vmem:[%s1909_s14 + $0x6c] sm:$0xf0]  ;;  %v1558_v22 = vld [vmem:[%s1909_s14 + $0x78] sm:$0xf]  ;;  %v1257_v34 = vand.u32 %v1742_v16, %v1881_v5 }
  0x11   : > { %1799 = vmatpush.bf16.msra.mxu3 %v284_v8  ;;  %293 = vmatpush.bf16.msra.mxu0 %v284_v8  ;;  %v1757_v23 = vld [vmem:[%s1909_s14 + $0x7c] sm:$0xf0]  ;;  %v1555_v25 = vor.u32 %v1756_v21, %v1554_v19  ;;  %v1546_v27 = vld [vmem:[%s1909_s14 + $0x48] sm:$0xf]  ;;  %v1754_v28 = vld [vmem:[%s1909_s14 + $0x4c] sm:$0xf0] }
  0x12   : > { %v1559_v26 = vor.u32 %v1757_v23, %v1558_v22  ;;  %v1547_v31 = vor.u32 %v1754_v28, %v1546_v27  ;;  %v379_v32 = vld [vmem:[%s1909_s14] sm:$0xf]  ;;  %v380_v33 = vld [vmem:[%s1909_s14 + $0x4] sm:$0x1]  ;;  %v381_v35 = vld [vmem:[%s1909_s14 + $0x8] sm:$0xf] }
  0x13   : > { %1561 = vmatmul.msk.bf16.vlgmr.msra.gmra.mxu1 %vm266_vm2, %v1551_v20  ;;  %1562 = vmatmul.msk.bf16.vlgmr.msra.gmra.mxu2 %vm266_vm2, %v1555_v25  ;;  %v382_v36 = vld [vmem:[%s1909_s14 + $0xc] sm:$0x1]  ;;  %v399_v37 = vshrl.u32 %v379_v32, 16  ;;  %v402_v38 = vshll.u32 %v379_v32, 16  ;;  %v408_v39 = vshll.u32 %v380_v33, 16  ;;  %v413_v40 = vshrl.u32 %v381_v35, 16 }
  0x14   : > { %546 = vmatpush.bf16.msrb.mxu2 %v537_v9  ;;  %357 = vmatpush.bf16.msrb.mxu1 %v348_v11  ;;  %v416_v41 = vshll.u32 %v381_v35, 16  ;;  %v422_v42 = vshll.u32 %v382_v36, 16  ;;  %vm395_vm3 = vsmask.f32 3328  ;;  %vm396_vm4 = vsmask.f32 7440 }
  0x15   : > { %629 = vmatpush.bf16.msrb.mxu3 %v620_v10  ;;  %712 = vmatpush.bf16.msrb.mxu0 %v703_v12  ;;  %v401_v43 = vrot.slane %v399_v37, 4  ;;  %v404_v44 = vrot.slane %v402_v38, 5  ;;  %v415_v45 = vrot.slane %v413_v40, 4  ;;  %v410_v48 = vrot.slane %v408_v39, 5  ;;  %v383_v49 = vld [vmem:[%s1909_s14 + $0x10] sm:$0xf]  ;;  %vm1935_vm5 = vmor %vm395_vm3, %vm396_vm4 }
  0x16   : > { %1563 = vmatmul.msk.bf16.vlgmr.msra.gmra.mxu3 %vm266_vm2, %v1559_v26  ;;  %1560 = vmatmul.msk.bf16.vlgmr.msra.gmra.mxu0 %vm266_vm2, %v1547_v31  ;;  %v418_v46 = vrot.slane %v416_v41, 5  ;;  %v424_v52 = vrot.slane %v422_v42, 5  ;;  %v385_v53 = vld [vmem:[%s1909_s14 + $0x18] sm:$0xf]  ;;  %v1566_v54 = vld [vmem:[%s1909_s14] sm:$0xf] }
  0x17   : > { %v405_v47 = vor.u32 %v404_v44, %v401_v43  ;;  %v427_v56 = vshrl.u32 %v383_v49, 16  ;;  %v430_v57 = vshll.u32 %v383_v49, 16  ;;  %v1750_v58 = vld [vmem:[%s1909_s14 + $0x4] sm:$0xf0]  ;;  %v441_v60 = vshrl.u32 %v385_v53, 16  ;;  %s1749_s25 = sshll.u32 %s2245_s19, 5 }
  0x18   : > { %989 = vmatpush.bf16.msra.mxu2 %v980_v24  ;;  %906 = vmatpush.bf16.msra.mxu1 %v897_v30  ;;  %v419_v51 = vor.u32 %v418_v46, %v415_v45  ;;  %v444_v61 = vshll.u32 %v385_v53, 16  ;;  %v1600_v63 = vld [vmem:[%s1909_s14 + $0x90] sm:$0xf]  ;;  %v1758_v0 = vld [vmem:[%s1909_s14 + $0x94] sm:$0xf0]  ;;  %v1567_v12 = vor.u32 %v1750_v58, %v1566_v54  ;;  %s224_s28 = scalar_lea.vmem %s2241_s5, %s1749_s25 }
  0x19   : > { %1072 = vmatpush.bf16.msra.mxu3 %v1063_v29  ;;  %1266 = vmatpush.bf16.msra.mxu0 %v1257_v34  ;;  %v406_v55 = vrot.slane %v405_v47, 4  ;;  %v429_v1 = vrot.slane %v427_v56, 4  ;;  %v432_v2 = vrot.slane %v430_v57, 5  ;;  %v1629_v5 = vld [vmem:[%s1909_s14 + $0xd8] sm:$0xf]  ;;  %v443_v7 = vrot.slane %v441_v60, 4 }
  0x1a   : > { %v420_v59 = vrot.slane %v419_v51, 4  ;;  %v1762_v6 = vld [vmem:[%s1909_s14 + $0xdc] sm:$0xf0]  ;;  %v446_v8 = vrot.slane %v444_v61, 5  ;;  %v384_v10 = vld [vmem:[%s1909_s14 + $0x14] sm:$0x1]  ;;  %v1601_v14 = vor.u32 %v1758_v0, %v1600_v63 }
  0x1b   : > { %v411_v62 = vsel %vm1935_vm5, %v406_v55, %v410_v48  ;;  %v386_v11 = vld [vmem:[%s1909_s14 + $0x1c] sm:$0x1]  ;;  %v1630_v15 = vor.u32 %v1762_v6, %v1629_v5  ;;  %v433_v16 = vor.u32 %v432_v2, %v429_v1  ;;  %v436_v17 = vshll.u32 %v384_v10, 16  ;;  %v387_v24 = vld [vmem:[%s1909_s14 + $0x20] sm:$0xf] }
  0x1c   : > { %v425_v3 = vsel %vm1935_vm5, %v420_v59, %v424_v52  ;;  %v512_v4 = vunpack.c.l.b16 %v411_v62  ;;  %v447_v18 = vor.u32 %v446_v8, %v443_v7  ;;  %v450_v19 = vshll.u32 %v386_v11, 16  ;;  %v389_v25 = vld [vmem:[%s1909_s14 + $0x28] sm:$0xf]  ;;  %v1570_v32 = vld [vmem:[%s1909_s14 + $0x10] sm:$0xf] }
  0x1d   : > { %v513_v9 = vunpack.c.l.b16 %v425_v3  ;;  %v434_v20 = vrot.slane %v433_v16, 4  ;;  %v438_v21 = vrot.slane %v436_v17, 5  ;;  %v455_v26 = vshrl.u32 %v387_v24, 16  ;;  %v1751_v33 = vld [vmem:[%s1909_s14 + $0x14] sm:$0xf0] }
  0x1e   : > { %v448_v22 = vrot.slane %v447_v18, 4  ;;  %v452_v23 = vrot.slane %v450_v19, 5  ;;  %v458_v27 = vshll.u32 %v387_v24, 16  ;;  %v469_v30 = vshrl.u32 %v389_v25, 16  ;;  %v1604_v36 = vld [vmem:[%s1909_s14 + $0xa0] sm:$0xf] }
  0x1f   : > { %v520_v13 = vpack.c.b16 %v513_v9, %v512_v4  ;;  %v439_v28 = vsel %vm1935_vm5, %v434_v20, %v438_v21  ;;  %v472_v31 = vshll.u32 %v389_v25, 16  ;;  %v1759_v37 = vld [vmem:[%s1909_s14 + $0xa4] sm:$0xf0]  ;;  %v1763_v39 = vld [vmem:[%s1909_s14 + $0xec] sm:$0xf0]  ;;  %v457_v40 = vrot.slane %v455_v26, 4 }
  0x20   : > { %v453_v29 = vsel %vm1935_vm5, %v448_v22, %v452_v23  ;;  %v514_v34 = vunpack.c.l.b16 %v439_v28  ;;  %v1633_v38 = vld [vmem:[%s1909_s14 + $0xe8] sm:$0xf]  ;;  %v460_v41 = vrot.slane %v458_v27, 5  ;;  %v471_v42 = vrot.slane %v469_v30, 4  ;;  %v388_v44 = vld [vmem:[%s1909_s14 + $0x24] sm:$0x1] }
  0x21   : > { %v515_v35 = vunpack.c.l.b16 %v453_v29  ;;  %v474_v43 = vrot.slane %v472_v31, 5  ;;  %v390_v45 = vld [vmem:[%s1909_s14 + $0x2c] sm:$0x1]  ;;  %v1571_v46 = vor.u32 %v1751_v33, %v1570_v32  ;;  %v1605_v48 = vor.u32 %v1759_v37, %v1604_v36  ;;  %v391_v55 = vld [vmem:[%s1909_s14 + $0x30] sm:$0xf] }
  0x22   : > { %v1634_v49 = vor.u32 %v1763_v39, %v1633_v38  ;;  %v461_v51 = vor.u32 %v460_v41, %v457_v40  ;;  %v464_v52 = vshll.u32 %v388_v44, 16  ;;  %v478_v54 = vshll.u32 %v390_v45, 16  ;;  %v393_v56 = vld [vmem:[%s1909_s14 + $0x38] sm:$0xf]  ;;  %v392_v7 = vld [vmem:[%s1909_s14 + $0x34] sm:$0x1] }
  0x23   : > { %1580 = vmatmul.msk.bf16.vlgmr.msrb.gmra.mxu1 %vm266_vm2, %v1567_v12  ;;  %1585 = vmatmul.msk.bf16.vlgmr.msrb.gmra.mxu2 %vm266_vm2, %v520_v13  ;;  %v521_v47 = vpack.c.b16 %v515_v35, %v514_v34  ;;  %v475_v53 = vor.u32 %v474_v43, %v471_v42  ;;  %v483_v61 = vshrl.u32 %v391_v55, 16  ;;  %v486_v62 = vshll.u32 %v391_v55, 16  ;;  %v394_v8 = vld [vmem:[%s1909_s14 + $0x3c] sm:$0x1]  ;;  %v1574_v9 = vld [vmem:[%s1909_s14 + $0x20] sm:$0xf] }
  0x24   : > { %v462_v57 = vrot.slane %v461_v51, 4  ;;  %v466_v58 = vrot.slane %v464_v52, 5  ;;  %v480_v60 = vrot.slane %v478_v54, 5  ;;  %v497_v63 = vshrl.u32 %v393_v56, 16  ;;  %v1752_v10 = vld [vmem:[%s1909_s14 + $0x24] sm:$0xf0] }
  0x25   : > { %v476_v59 = vrot.slane %v475_v53, 4  ;;  %v500_v0 = vshll.u32 %v393_v56, 16  ;;  %v485_v3 = vrot.slane %v483_v61, 4  ;;  %v488_v4 = vrot.slane %v486_v62, 5  ;;  %v1608_v13 = vld [vmem:[%s1909_s14 + $0xb0] sm:$0xf] }
  0x26   : > { %1614 = vmatmul.msk.bf16.vlgmr.msrb.gmra.mxu3 %vm266_vm2, %v1601_v14  ;;  %1643 = vmatmul.msk.bf16.vlgmr.msrb.gmra.mxu0 %vm266_vm2, %v1630_v15  ;;  %v467_v1 = vsel %vm1935_vm5, %v462_v57, %v466_v58  ;;  %v499_v5 = vrot.slane %v497_v63, 4  ;;  %v1760_v14 = vld [vmem:[%s1909_s14 + $0xb4] sm:$0xf0]  ;;  %v1764_v16 = vld [vmem:[%s1909_s14 + $0xfc] sm:$0xf0]  ;;  %v492_v18 = vshll.u32 %v392_v7, 16  ;;  %v1575_v21 = vor.u32 %v1752_v10, %v1574_v9 }
  0x27   : > { %v481_v2 = vsel %vm1935_vm5, %v476_v59, %v480_v60  ;;  %v502_v6 = vrot.slane %v500_v0, 5  ;;  %v516_v11 = vunpack.c.l.b16 %v467_v1  ;;  %v1637_v15 = vld [vmem:[%s1909_s14 + $0xf8] sm:$0xf]  ;;  %v489_v17 = vor.u32 %v488_v4, %v485_v3  ;;  %v1647_v29 = vld [vmem:[%s1909_s14 + $0x90] sm:$0xf] }
  0x28   : > { %v517_v12 = vunpack.c.l.b16 %v481_v2  ;;  %v506_v20 = vshll.u32 %v394_v8, 16  ;;  %v1609_v23 = vor.u32 %v1760_v14, %v1608_v13  ;;  %v1638_v24 = vor.u32 %v1764_v16, %v1637_v15  ;;  %v1649_v30 = vld [vmem:[%s1909_s14 + $0x98] sm:$0xf]  ;;  %v1726_v31 = vld [vmem:[%s1909_s14 + $0x8] sm:$0xf] }
  0x29   : > { %v503_v19 = vor.u32 %v502_v6, %v499_v5  ;;  %v490_v25 = vrot.slane %v489_v17, 4  ;;  %v494_v26 = vrot.slane %v492_v18, 5  ;;  %v1728_v32 = vld [vmem:[%s1909_s14 + $0x10] sm:$0xf]  ;;  %v759_v35 = vshrl.u32 %v1647_v29, 16 }
  0x2a   : > { %v522_v22 = vpack.c.b16 %v517_v12, %v516_v11  ;;  %v508_v28 = vrot.slane %v506_v20, 5  ;;  %v762_v36 = vshll.u32 %v1647_v29, 16  ;;  %v773_v37 = vshrl.u32 %v1649_v30, 16  ;;  %v1578_v43 = vld [vmem:[%s1909_s14 + $0x30] sm:$0xf] }
  0x2b   : > { %v504_v27 = vrot.slane %v503_v19, 4  ;;  %v495_v33 = vsel %vm1935_vm5, %v490_v25, %v494_v26  ;;  %v776_v38 = vshll.u32 %v1649_v30, 16  ;;  %v1119_v39 = vshrl.u32 %v1726_v31, 16  ;;  %v1753_v44 = vld [vmem:[%s1909_s14 + $0x34] sm:$0xf0] }
  0x2c   : > { %v1122_v40 = vshll.u32 %v1726_v31, 16  ;;  %v1133_v41 = vshrl.u32 %v1728_v32, 16  ;;  %v1136_v42 = vshll.u32 %v1728_v32, 16  ;;  %v518_v45 = vunpack.c.l.b16 %v495_v33  ;;  %v1650_v55 = vld [vmem:[%s1909_s14 + $0x9c] sm:$0x1] }
  0x2d   : > { %v509_v34 = vsel %vm1935_vm5, %v504_v27, %v508_v28  ;;  %v761_v51 = vrot.slane %v759_v35, 4  ;;  %v764_v52 = vrot.slane %v762_v36, 5  ;;  %v775_v53 = vrot.slane %v773_v37, 4  ;;  %v1727_v60 = vld [vmem:[%s1909_s14 + $0xc] sm:$0x1] }
  0x2e   : > { %v778_v54 = vrot.slane %v776_v38, 5  ;;  %v1121_v56 = vrot.slane %v1119_v39, 4  ;;  %v1124_v57 = vrot.slane %v1122_v40, 5  ;;  %v1135_v58 = vrot.slane %v1133_v41, 4  ;;  %v1729_v61 = vld [vmem:[%s1909_s14 + $0x14] sm:$0x1] }
  0x2f   : > { %v1138_v59 = vrot.slane %v1136_v42, 5  ;;  %v1579_v62 = vor.u32 %v1753_v44, %v1578_v43  ;;  %v1641_v1 = vld [vmem:[%s1909_s14 + $0x108] sm:$0xf]  ;;  %v1765_v2 = vld [vmem:[%s1909_s14 + $0x10c] sm:$0xf0]  ;;  %v765_v3 = vor.u32 %v764_v52, %v761_v51  ;;  %v782_v6 = vshll.u32 %v1650_v55, 16 }
  0x30   : > { %v779_v5 = vor.u32 %v778_v54, %v775_v53  ;;  %v1125_v7 = vor.u32 %v1124_v57, %v1121_v56  ;;  %v1128_v8 = vshll.u32 %v1727_v60, 16  ;;  %v1142_v10 = vshll.u32 %v1729_v61, 16  ;;  %v1651_v12 = vld [vmem:[%s1909_s14 + $0xa0] sm:$0xf]  ;;  %v1653_v13 = vld [vmem:[%s1909_s14 + $0xa8] sm:$0xf] }
  0x31   : > { %v1139_v9 = vor.u32 %v1138_v59, %v1135_v58  ;;  %v1642_v11 = vor.u32 %v1765_v2, %v1641_v1  ;;  %v766_v14 = vrot.slane %v765_v3, 4  ;;  %v784_v17 = vrot.slane %v782_v6, 5  ;;  %v1730_v26 = vld [vmem:[%s1909_s14 + $0x18] sm:$0xf]  ;;  %v1732_v27 = vld [vmem:[%s1909_s14 + $0x20] sm:$0xf] }
  0x32   : > { %v780_v16 = vrot.slane %v779_v5, 4  ;;  %v1126_v18 = vrot.slane %v1125_v7, 4  ;;  %v1130_v19 = vrot.slane %v1128_v8, 5  ;;  %v804_v25 = vshll.u32 %v1653_v13, 16  ;;  %v1652_v32 = vld [vmem:[%s1909_s14 + $0xa4] sm:$0x1] }
  0x33   : > { %1581 = vmatmul.msk.bf16.gmra.mxu1 %vm266_vm2, %v1571_v46  ;;  %1586 = vmatmul.msk.bf16.gmra.mxu2 %vm266_vm2, %v521_v47  ;;  %v519_v46 = vunpack.c.l.b16 %v509_v34  ;;  %v1612_v47 = vld [vmem:[%s1909_s14 + $0xc0] sm:$0xf]  ;;  %v1140_v20 = vrot.slane %v1139_v9, 4  ;;  %v1654_v37 = vld [vmem:[%s1909_s14 + $0xac] sm:$0x1]  ;;  %v1147_v38 = vshrl.u32 %v1730_v26, 16 }
  0x34   : > { %v785_v29 = vsel %vm1935_vm5, %v780_v16, %v784_v17  ;;  %v1131_v30 = vsel %vm1935_vm5, %v1126_v18, %v1130_v19  ;;  %v806_v36 = vrot.slane %v804_v25, 5  ;;  %v1150_v39 = vshll.u32 %v1730_v26, 16  ;;  %v1679_v44 = vld [vmem:[%s1909_s14 + $0x8] sm:$0xf]  ;;  %v1731_v60 = vld [vmem:[%s1909_s14 + $0x1c] sm:$0x1] }
  0x35   : > { %v523_v63 = vpack.c.b16 %v519_v46, %v518_v45  ;;  %v1161_v40 = vshrl.u32 %v1732_v27, 16  ;;  %v1164_v41 = vshll.u32 %v1732_v27, 16  ;;  %v873_v43 = vunpack.c.l.b16 %v785_v29  ;;  %v1766_v45 = vld [vmem:[%s1909_s14 + $0xc] sm:$0xf0]  ;;  %v1733_v61 = vld [vmem:[%s1909_s14 + $0x24] sm:$0x1] }
  0x36   : > { %1615 = vmatmul.msk.bf16.gmra.mxu3 %vm266_vm2, %v1605_v48  ;;  %1644 = vmatmul.msk.bf16.gmra.mxu0 %vm266_vm2, %v1634_v49  ;;  %v1761_v48 = vld [vmem:[%s1909_s14 + $0xc4] sm:$0xf0]  ;;  %v1648_v49 = vld [vmem:[%s1909_s14 + $0x94] sm:$0x1]  ;;  %v1232_v46 = vunpack.c.l.b16 %v1131_v30  ;;  %v796_v52 = vshll.u32 %v1652_v32, 16  ;;  %v810_v54 = vshll.u32 %v1654_v37, 16 }
  0x37   : > { %v1613_v0 = vor.u32 %v1761_v48, %v1612_v47  ;;  %v768_v4 = vshll.u32 %v1648_v49, 16  ;;  %v1708_v48 = vld [vmem:[%s1909_s14 + $0x50] sm:$0xf]  ;;  %v1770_v49 = vld [vmem:[%s1909_s14 + $0x54] sm:$0xf0]  ;;  %v1149_v55 = vrot.slane %v1147_v38, 4 }
  0x38   : > { %v1152_v56 = vrot.slane %v1150_v39, 5  ;;  %v1163_v57 = vrot.slane %v1161_v40, 4  ;;  %v1166_v58 = vrot.slane %v1164_v41, 5  ;;  %v798_v2 = vrot.slane %v796_v52, 5  ;;  %v1655_v9 = vld [vmem:[%s1909_s14 + $0xb0] sm:$0xf] }
  0x39   : > { %v770_v15 = vrot.slane %v768_v4, 5  ;;  %v812_v4 = vrot.slane %v810_v54, 5  ;;  %v1156_v6 = vshll.u32 %v1731_v60, 16  ;;  %v1170_v8 = vshll.u32 %v1733_v61, 16  ;;  %v1736_v18 = vld [vmem:[%s1909_s14 + $0x30] sm:$0xf] }
  0x3a   : > { %v1153_v5 = vor.u32 %v1152_v56, %v1149_v55  ;;  %v1167_v7 = vor.u32 %v1166_v58, %v1163_v57  ;;  %v815_v19 = vshrl.u32 %v1655_v9, 16  ;;  %v1189_v25 = vshrl.u32 %v1736_v18, 16  ;;  %v1767_v32 = vld [vmem:[%s1909_s14 + $0x1c] sm:$0xf0]  ;;  %v1656_v38 = vld [vmem:[%s1909_s14 + $0xb4] sm:$0x1] }
  0x3b   : > { %v771_v28 = vsel %vm1935_vm5, %v766_v14, %v770_v15  ;;  %v1158_v15 = vrot.slane %v1156_v6, 5  ;;  %v1172_v17 = vrot.slane %v1170_v8, 5  ;;  %v1192_v26 = vshll.u32 %v1736_v18, 16  ;;  %v1658_v39 = vld [vmem:[%s1909_s14 + $0xbc] sm:$0x1] }
  0x3c   : > { %v872_v42 = vunpack.c.l.b16 %v771_v28  ;;  %v1154_v14 = vrot.slane %v1153_v5, 4  ;;  %v1168_v16 = vrot.slane %v1167_v7, 4  ;;  %v824_v52 = vshll.u32 %v1656_v38, 16  ;;  %v1659_v6 = vld [vmem:[%s1909_s14 + $0xc0] sm:$0xf] }
  0x3d   : > { %v838_v54 = vshll.u32 %v1658_v39, 16  ;;  %v1661_v7 = vld [vmem:[%s1909_s14 + $0xc8] sm:$0xf] }
  0x3e   : > { %v880_v59 = vpack.c.b16 %v873_v43, %v872_v42  ;;  %v1159_v29 = vsel %vm1935_vm5, %v1154_v14, %v1158_v15  ;;  %v1173_v30 = vsel %vm1935_vm5, %v1168_v16, %v1172_v17  ;;  %v1771_v42 = vld [vmem:[%s1909_s14 + $0x64] sm:$0xf0]  ;;  %v857_v14 = vshrl.u32 %v1661_v7, 16 }
  0x3f   : > { %v1234_v43 = vunpack.c.l.b16 %v1159_v29  ;;  %v860_v15 = vshll.u32 %v1661_v7, 16  ;;  %v1720_v7 = vld [vmem:[%s1909_s14 + $0x80] sm:$0xf] }
  0x43   : > { %1582 = vmatmul.msk.bf16.gmra.mxu1 %vm266_vm2, %v1575_v21  ;;  %1587 = vmatmul.msk.bf16.gmra.mxu2 %vm266_vm2, %v522_v22  ;;  %v1144_v21 = vrot.slane %v1142_v10, 5  ;;  %v787_v22 = vshrl.u32 %v1651_v12, 16  ;;  %v1657_v10 = vld [vmem:[%s1909_s14 + $0xb8] sm:$0xf] }
  0x45   : > { %v1145_v31 = vsel %vm1935_vm5, %v1140_v20, %v1144_v21  ;;  %v789_v33 = vrot.slane %v787_v22, 4  ;;  %v818_v20 = vshll.u32 %v1655_v9, 16  ;;  %v829_v21 = vshrl.u32 %v1657_v10, 16 }
  0x46   : > { %1616 = vmatmul.msk.bf16.gmra.mxu3 %vm266_vm2, %v1609_v23  ;;  %1645 = vmatmul.msk.bf16.gmra.mxu0 %vm266_vm2, %v1638_v24  ;;  %v790_v23 = vshll.u32 %v1651_v12, 16  ;;  %v801_v24 = vshrl.u32 %v1653_v13, 16  ;;  %v1233_v47 = vunpack.c.l.b16 %v1145_v31  ;;  %v1734_v13 = vld [vmem:[%s1909_s14 + $0x28] sm:$0xf]  ;;  %v832_v22 = vshll.u32 %v1657_v10, 16 }
  0x47   : > { %v1683_v31 = vld [vmem:[%s1909_s14 + $0x18] sm:$0xf] }
  0x48   : > { %v792_v34 = vrot.slane %v790_v23, 5  ;;  %v803_v35 = vrot.slane %v801_v24, 4  ;;  %v1175_v23 = vshrl.u32 %v1734_v13, 16  ;;  %v1178_v24 = vshll.u32 %v1734_v13, 16  ;;  %v1738_v10 = vld [vmem:[%s1909_s14 + $0x38] sm:$0xf] }
  0x49   : > { %v834_v37 = vrot.slane %v832_v22, 5  ;;  %v1684_v55 = vor.u32 %v1767_v32, %v1683_v31  ;;  %v846_v13 = vshll.u32 %v1659_v6, 16  ;;  %v1203_v18 = vshrl.u32 %v1738_v10, 16 }
  0x4a   : > { %v793_v51 = vor.u32 %v792_v34, %v789_v33  ;;  %v807_v53 = vor.u32 %v806_v36, %v803_v35  ;;  %v1712_v33 = vld [vmem:[%s1909_s14 + $0x60] sm:$0xf]  ;;  %v817_v34 = vrot.slane %v815_v19, 4  ;;  %v820_v35 = vrot.slane %v818_v20, 5 }
  0x4b   : > { %v831_v36 = vrot.slane %v829_v21, 4  ;;  %v1177_v40 = vrot.slane %v1175_v23, 4  ;;  %v1180_v41 = vrot.slane %v1178_v24, 5  ;;  %v1713_v56 = vor.u32 %v1771_v42, %v1712_v33  ;;  %v1687_v24 = vld [vmem:[%s1909_s14 + $0x28] sm:$0xf] }
  0x4c   : > { %v794_v1 = vrot.slane %v793_v51, 4  ;;  %v808_v3 = vrot.slane %v807_v53, 4  ;;  %v821_v51 = vor.u32 %v820_v35, %v817_v34  ;;  %v1206_v19 = vshll.u32 %v1738_v10, 16  ;;  %v1660_v34 = vld [vmem:[%s1909_s14 + $0xc4] sm:$0x1] }
  0x4d   : > { %v835_v53 = vor.u32 %v834_v37, %v831_v36  ;;  %v1181_v57 = vor.u32 %v1180_v41, %v1177_v40  ;;  %v848_v29 = vrot.slane %v846_v13, 5  ;;  %v862_v31 = vrot.slane %v860_v15, 5  ;;  %v1662_v35 = vld [vmem:[%s1909_s14 + $0xcc] sm:$0x1] }
  0x4e   : > { %v813_v12 = vsel %vm1935_vm5, %v808_v3, %v812_v4  ;;  %v1205_v36 = vrot.slane %v1203_v18, 4  ;;  %v1208_v37 = vrot.slane %v1206_v19, 5 }
  0x4f   : > { %v875_v28 = vunpack.c.l.b16 %v813_v12  ;;  %v843_v12 = vshrl.u32 %v1659_v6, 16  ;;  %v1769_v6 = vld [vmem:[%s1909_s14 + $0x3c] sm:$0xf0] }
  0x53   : > { %1583 = vmatmul.msk.bf16.gmra.mxu1 %vm266_vm2, %v1579_v62  ;;  %1588 = vmatmul.msk.bf16.gmra.mxu2 %vm266_vm2, %v523_v63  ;;  %v1680_v62 = vor.u32 %v1766_v45, %v1679_v44  ;;  %v1709_v63 = vor.u32 %v1770_v49, %v1708_v48  ;;  %v1235_v44 = vunpack.c.l.b16 %v1173_v30  ;;  %v1735_v45 = vld [vmem:[%s1909_s14 + $0x2c] sm:$0x1]  ;;  %v1737_v49 = vld [vmem:[%s1909_s14 + $0x34] sm:$0x1]  ;;  %v859_v30 = vrot.slane %v857_v14, 4 }
  0x54   : > { %v1184_v58 = vshll.u32 %v1735_v45, 16  ;;  %v1198_v61 = vshll.u32 %v1737_v49, 16 }
  0x56   : > { %1617 = vmatmul.msk.bf16.gmra.mxu3 %vm266_vm2, %v1613_v0  ;;  %1646 = vmatmul.msk.bf16.gmra.mxu0 %vm266_vm2, %v1642_v11  ;;  %v1240_v0 = vpack.c.b16 %v1233_v47, %v1232_v46  ;;  %v799_v11 = vsel %vm1935_vm5, %v794_v1, %v798_v2  ;;  %v1191_v46 = vrot.slane %v1189_v25, 4  ;;  %v1194_v47 = vrot.slane %v1192_v26, 5  ;;  %v1768_v25 = vld [vmem:[%s1909_s14 + $0x2c] sm:$0xf0] }
  0x57   : > { %v874_v27 = vunpack.c.l.b16 %v799_v11  ;;  %v840_v1 = vrot.slane %v838_v54, 5  ;;  %v1182_v2 = vrot.slane %v1181_v57, 4  ;;  %v1186_v3 = vrot.slane %v1184_v58, 5  ;;  %v1740_v11 = vld [vmem:[%s1909_s14 + $0x40] sm:$0xf] }
  0x58   : > { %v1195_v60 = vor.u32 %v1194_v47, %v1191_v46  ;;  %v1200_v5 = vrot.slane %v1198_v61, 5  ;;  %v1217_v20 = vshrl.u32 %v1740_v11, 16  ;;  %v1220_v21 = vshll.u32 %v1740_v11, 16  ;;  %v1716_v26 = vld [vmem:[%s1909_s14 + $0x70] sm:$0xf] }
  0x59   : > { %v881_v48 = vpack.c.b16 %v875_v28, %v874_v27  ;;  %v1187_v16 = vsel %vm1935_vm5, %v1182_v2, %v1186_v3  ;;  %v1772_v27 = vld [vmem:[%s1909_s14 + $0x74] sm:$0xf0]  ;;  %v845_v28 = vrot.slane %v843_v12, 4  ;;  %v1688_v41 = vor.u32 %v1768_v25, %v1687_v24 }
  0x5a   : > { %v1196_v4 = vrot.slane %v1195_v60, 4  ;;  %v1236_v32 = vunpack.c.l.b16 %v1187_v16  ;;  %v1219_v38 = vrot.slane %v1217_v20, 4  ;;  %v1222_v39 = vrot.slane %v1220_v21, 5 }
  0x5b   : > { %v1717_v42 = vor.u32 %v1772_v27, %v1716_v26  ;;  %v849_v45 = vor.u32 %v848_v29, %v845_v28  ;;  %v852_v46 = vshll.u32 %v1660_v34, 16  ;;  %v863_v47 = vor.u32 %v862_v31, %v859_v30 }
  0x5c   : > { %v1201_v17 = vsel %vm1935_vm5, %v1196_v4, %v1200_v5  ;;  %v1691_v5 = vld [vmem:[%s1909_s14 + $0x38] sm:$0xf] }
  0x5d   : > { %v1237_v33 = vunpack.c.l.b16 %v1201_v17  ;;  %v864_v57 = vrot.slane %v863_v47, 4  ;;  %v1692_v13 = vor.u32 %v1769_v6, %v1691_v5 }
  0x5f   : > { %v1242_v49 = vpack.c.b16 %v1237_v33, %v1236_v32 }
  0x63   : > { %1664 = vmatmul.msk.bf16.vlgmr.msra.gmra.mxu1 %vm266_vm2, %v880_v59  ;;  %1693 = vmatmul.msk.bf16.vlgmr.msra.gmra.mxu2 %vm266_vm2, %v1680_v62  ;;  %v1241_v59 = vpack.c.b16 %v1235_v44, %v1234_v43  ;;  %v822_v62 = vrot.slane %v821_v51, 4  ;;  %v1739_v43 = vld [vmem:[%s1909_s14 + $0x3c] sm:$0x1]  ;;  %v1741_v44 = vld [vmem:[%s1909_s14 + $0x44] sm:$0x1]  ;;  %v1209_v51 = vor.u32 %v1208_v37, %v1205_v36 }
  0x64   : > { %v1226_v54 = vshll.u32 %v1741_v44, 16 }
  0x66   : > { %1722 = vmatmul.msk.bf16.vlgmr.msra.gmra.mxu3 %vm266_vm2, %v1709_v63  ;;  %1743 = vmatmul.msk.bf16.vlgmr.msra.gmra.mxu0 %vm266_vm2, %v1240_v0  ;;  %v826_v63 = vrot.slane %v824_v52, 5  ;;  %v836_v0 = vrot.slane %v835_v53, 4  ;;  %v1212_v52 = vshll.u32 %v1739_v43, 16  ;;  %v1223_v53 = vor.u32 %v1222_v39, %v1219_v38 }
  0x68   : > { %v827_v8 = vsel %vm1935_vm5, %v822_v62, %v826_v63  ;;  %v841_v9 = vsel %vm1935_vm5, %v836_v0, %v840_v1  ;;  %v1214_v60 = vrot.slane %v1212_v52, 5  ;;  %v1224_v61 = vrot.slane %v1223_v53, 4 }
  0x69   : > { %v876_v22 = vunpack.c.l.b16 %v827_v8  ;;  %v877_v23 = vunpack.c.l.b16 %v841_v9  ;;  %v1228_v62 = vrot.slane %v1226_v54, 5  ;;  %v1773_v8 = vld [vmem:[%s1909_s14 + $0x84] sm:$0xf0] }
  0x6a   : > { %v1721_v14 = vor.u32 %v1773_v8, %v1720_v7  ;;  %v2145_v8 = vld [vmem:[%s2238_s2] ss:$0 sm:$0xff] }
  0x6b   : > { %v882_v40 = vpack.c.b16 %v877_v23, %v876_v22  ;;  %v1229_v2 = vsel %vm1935_vm5, %v1224_v61, %v1228_v62 }
  0x6c   : > { %v1239_v10 = vunpack.c.l.b16 %v1229_v2 }
  0x73   : > { %1665 = vmatmul.msk.bf16.gmra.mxu1 %vm266_vm2, %v881_v48  ;;  %1694 = vmatmul.msk.bf16.gmra.mxu2 %vm266_vm2, %v1684_v55  ;;  %v866_v48 = vshll.u32 %v1662_v35, 16  ;;  %v850_v55 = vrot.slane %v849_v45, 4 }
  0x75   : > { %v868_v58 = vrot.slane %v866_v48, 5 }
  0x76   : > { %1723 = vmatmul.msk.bf16.gmra.mxu3 %vm266_vm2, %v1713_v56  ;;  %1744 = vmatmul.msk.bf16.gmra.mxu0 %vm266_vm2, %v1241_v59  ;;  %v854_v56 = vrot.slane %v852_v46, 5  ;;  %v1210_v59 = vrot.slane %v1209_v51, 4 }
  0x77   : > { %v869_v0 = vsel %vm1935_vm5, %v864_v57, %v868_v58 }
  0x78   : > { %v855_v63 = vsel %vm1935_vm5, %v850_v55, %v854_v56  ;;  %v1215_v1 = vsel %vm1935_vm5, %v1210_v59, %v1214_v60  ;;  %v879_v4 = vunpack.c.l.b16 %v869_v0 }
  0x79   : > { %v878_v3 = vunpack.c.l.b16 %v855_v63  ;;  %v1238_v9 = vunpack.c.l.b16 %v1215_v1 }
  0x7b   : > { %v883_v11 = vpack.c.b16 %v879_v4, %v878_v3  ;;  %v1243_v15 = vpack.c.b16 %v1239_v10, %v1238_v9 }
  0x83   : > { %1666 = vmatmul.msk.bf16.gmra.mxu1 %vm266_vm2, %v882_v40  ;;  %1695 = vmatmul.msk.bf16.gmra.mxu2 %vm266_vm2, %v1688_v41 }
  0x86   : > { %1724 = vmatmul.msk.bf16.gmra.mxu3 %vm266_vm2, %v1717_v42  ;;  %1745 = vmatmul.msk.bf16.gmra.mxu0 %vm266_vm2, %v1242_v49 }
  0x90   : > { %v300_v12 = vpop.f32.mrf.mxu1 }
  0x93   : > { %v295_v16 = vpop.f32.mrf.mxu0  ;;  %1667 = vmatmul.msk.bf16.gmra.mxu1 %vm266_vm2, %v883_v11  ;;  %1696 = vmatmul.msk.bf16.gmra.mxu2 %vm266_vm2, %v1692_v13 }
  0x96   : > { %1725 = vmatmul.msk.bf16.gmra.mxu3 %vm266_vm2, %v1721_v14  ;;  %1746 = vmatmul.msk.bf16.gmra.mxu0 %vm266_vm2, %v1243_v15  ;;  %v2102_v50 = vpop.f32.mrf.mxu2 }
  0x98   : > { %v2106_v18 = vpop.f32.mrf.mxu1 }
  0x99   : > { %v2104_v17 = vpop.f32.mrf.mxu3 }
  0x9b   : > { %v297_v19 = vpop.f32.mrf.mxu0 }
  0x9e   : > { %v2108_v20 = vpop.f32.mrf.mxu2 }
  0xa0   : > { %v359_v22 = vpop.f32.mrf.mxu1 }
  0xa1   : > { %v2110_v21 = vpop.f32.mrf.mxu3  ;;  %v360_v52 = vadd.f32 %v359_v22, %v295_v16 }
  0xa3   : > { %v714_v23 = vpop.f32.mrf.mxu0 }
  0xa6   : > { %v548_v24 = vpop.f32.mrf.mxu2 }
  0xa7   : > { %v568_v54 = vadd.f32 %v548_v24, %v360_v52 }
  0xa8   : > { %v361_v26 = vpop.f32.mrf.mxu1 }
  0xa9   : > { %v631_v25 = vpop.f32.mrf.mxu3  ;;  %v362_v59 = vadd.f32 %v361_v26, %v297_v19 }
  0xaa   : > { %v651_v57 = vadd.f32 %v631_v25, %v568_v54 }
  0xab   : > { %v716_v27 = vpop.f32.mrf.mxu0 }
  0xac   : > { %v734_v62 = vadd.f32 %v714_v23, %v651_v57 }
  0xae   : > { %v550_v28 = vpop.f32.mrf.mxu2 }
  0xaf   : > { %v569_v61 = vadd.f32 %v550_v28, %v362_v59 }
  0xb0   : > { %v364_v30 = vpop.f32.mrf.mxu1 }
  0xb1   : > { %v633_v29 = vpop.f32.mrf.mxu3  ;;  %v365_v5 = vadd.f32 %v364_v30, %v300_v12 }
  0xb2   : > { %v652_v2 = vadd.f32 %v633_v29, %v569_v61 }
  0xb3   : > { %v719_v31 = vpop.f32.mrf.mxu0 }
  0xb4   : > { %v735_v11 = vadd.f32 %v716_v27, %v652_v2 }
  0xb6   : > { %v553_v32 = vpop.f32.mrf.mxu2 }
  0xb7   : > { %v570_v9 = vadd.f32 %v553_v32, %v365_v5 }
  0xb8   : > { %v366_v34 = vpop.f32.mrf.mxu1 }
  0xb9   : > { %v636_v33 = vpop.f32.mrf.mxu3  ;;  %v367_v24 = vadd.f32 %v366_v34, %v2106_v18 }
  0xba   : > { %v653_v19 = vadd.f32 %v636_v33, %v570_v9 }
  0xbb   : > { %v2112_v35 = vpop.f32.mrf.mxu0 }
  0xbc   : > { %v736_v29 = vadd.f32 %v719_v31, %v653_v19 }
  0xbe   : > { %v555_v36 = vpop.f32.mrf.mxu2 }
  0xbf   : > { %v571_v27 = vadd.f32 %v555_v36, %v367_v24 }
  0xc0   : > { %v369_v38 = vpop.f32.mrf.mxu1 }
  0xc1   : > { %v638_v37 = vpop.f32.mrf.mxu3  ;;  %v370_v59 = vadd.f32 %v369_v38, %v2102_v50 }
  0xc2   : > { %v654_v54 = vadd.f32 %v638_v37, %v571_v27 }
  0xc3   : > { %v2114_v39 = vpop.f32.mrf.mxu0 }
  0xc4   : > { %v737_v36 = vadd.f32 %v2112_v35, %v654_v54 }
  0xc6   : > { %v558_v40 = vpop.f32.mrf.mxu2 }
  0xc8   : > { %v2118_v42 = vpop.f32.mrf.mxu1 }
  0xc9   : > { %v2116_v41 = vpop.f32.mrf.mxu3  ;;  %v372_v35 = vadd.f32 %v2118_v42, %v2108_v20 }
  0xcb   : > { %v2120_v43 = vpop.f32.mrf.mxu0 }
  0xce   : > { %v2122_v44 = vpop.f32.mrf.mxu2 }
  0xd0   : > { %v2126_v46 = vpop.f32.mrf.mxu1 }
  0xd1   : > { %v2124_v45 = vpop.f32.mrf.mxu3  ;;  %v375_v42 = vadd.f32 %v2126_v46, %v2104_v17 }
  0xd3   : > { %v2128_v47 = vpop.f32.mrf.mxu0 }
  0xd6   : > { %v2130_v48 = vpop.f32.mrf.mxu2 }
  0xd8   : > { %v2134_v51 = vpop.f32.mrf.mxu1 }
  0xd9   : > { %v2132_v49 = vpop.f32.mrf.mxu3  ;;  %v377_v46 = vadd.f32 %v2134_v51, %v2110_v21 }
  0xdb   : > { %v2136_v53 = vpop.f32.mrf.mxu0 }
  0xde   : > { %v2138_v55 = vpop.f32.mrf.mxu2 }
  0xdf   : > { %v575_v27 = vadd.f32 %v2138_v55, %v377_v46 }
  0xe0   : > { %v908_v58 = vpop.f32.mrf.mxu1 }
  0xe1   : > { %v2140_v56 = vpop.f32.mrf.mxu3  ;;  %v928_v63 = vadd.f32 %v908_v58, %v734_v62 }
  0xe2   : > { %v658_v54 = vadd.f32 %v2140_v56, %v575_v27 }
  0xe3   : > { %v1268_v60 = vpop.f32.mrf.mxu0 }
  0xe4   : > { %v741_v55 = vadd.f32 %v2136_v53, %v658_v54 }
  0xe6   : > { %v991_v0 = vpop.f32.mrf.mxu2 }
  0xe7   : > { %v1011_v3 = vadd.f32 %v991_v0, %v928_v63 }
  0xe8   : > { %v910_v4 = vpop.f32.mrf.mxu1 }
  0xe9   : > { %v1074_v1 = vpop.f32.mrf.mxu3  ;;  %v929_v13 = vadd.f32 %v910_v4, %v735_v11 }
  0xea   : > { %v1094_v6 = vadd.f32 %v1074_v1, %v1011_v3  ;;  %v573_v3 = vadd.f32 %v2122_v44, %v372_v35 }
  0xeb   : > { %v1270_v7 = vpop.f32.mrf.mxu0 }
  0xec   : > { %v1288_v10 = vadd.f32 %v1268_v60, %v1094_v6  ;;  %v572_v60 = vadd.f32 %v558_v40, %v370_v59  ;;  %v656_v11 = vadd.f32 %v2124_v45, %v573_v3 }
  0xee   : > { %v2148_v14 = vadd.f32 %v2145_v8, %v1288_v10  ;;  %v993_v15 = vpop.f32.mrf.mxu2  ;;  %v655_v1 = vadd.f32 %v2116_v41, %v572_v60 }
  0xef   : > { %v1012_v22 = vadd.f32 %v993_v15, %v929_v13  ;;  %v574_v15 = vadd.f32 %v2130_v48, %v375_v42 }
  0xf0   : > { %1308 = vadd.xlane.f32.xlu0 %v2148_v14  ;;  %v913_v12 = vpop.f32.mrf.mxu1  ;;  %v1337_v23 = vmul.f32 %v2148_v14, %v2148_v14  ;;  %v738_v5 = vadd.f32 %v2114_v39, %v655_v1 }
  0xf1   : > { %v1076_v16 = vpop.f32.mrf.mxu3  ;;  %v930_v30 = vadd.f32 %v913_v12, %v736_v29 }
  0xf2   : > { %v1095_v25 = vadd.f32 %v1076_v16, %v1012_v22  ;;  %1345 = vadd.xlane.f32.xlu2 %v1337_v23  ;;  %v739_v16 = vadd.f32 %v2120_v43, %v656_v11 }
  0xf3   : > { %v1273_v26 = vpop.f32.mrf.mxu0 }
  0xf4   : > { %v1289_v28 = vadd.f32 %v1270_v7, %v1095_v25  ;;  %v657_v25 = vadd.f32 %v2132_v49, %v574_v15 }
  0xf6   : > { %v2155_v32 = vadd.f32 %v2145_v8, %v1289_v28  ;;  %v996_v33 = vpop.f32.mrf.mxu2  ;;  %v740_v29 = vadd.f32 %v2128_v47, %v657_v25 }
  0xf7   : > { %v1013_v57 = vadd.f32 %v996_v33, %v930_v30 }
  0xf8   : > { %1310 = vadd.xlane.f32.xlu0 %v2155_v32  ;;  %v915_v58 = vpop.f32.mrf.mxu1  ;;  %v1338_v63 = vmul.f32 %v2155_v32, %v2155_v32 }
  0xf9   : > { %v1079_v52 = vpop.f32.mrf.mxu3  ;;  %v931_v31 = vadd.f32 %v915_v58, %v737_v36 }
  0xfa   : > { %v1096_v18 = vadd.f32 %v1079_v52, %v1013_v57 }
  0xfb   : > { %v1275_v34 = vpop.f32.mrf.mxu0 }
  0xfc   : > { %v1290_v61 = vadd.f32 %v1273_v26, %v1096_v18 }
  0xfe   : > { %v2161_v62 = vadd.f32 %v2145_v8, %v1290_v61  ;;  %v998_v37 = vpop.f32.mrf.mxu2 }
  0xff   : > { %v1014_v2 = vadd.f32 %v998_v37, %v931_v31 }
 0x100   : > { %1312 = vadd.xlane.f32.xlu1 %v2161_v62  ;;  %1347 = vadd.xlane.f32.xlu0 %v1338_v63  ;;  %v918_v50 = vpop.f32.mrf.mxu1  ;;  %v1339_v38 = vmul.f32 %v2161_v62, %v2161_v62 }
 0x101   : > { %v1081_v0 = vpop.f32.mrf.mxu3  ;;  %v932_v41 = vadd.f32 %v918_v50, %v738_v5 }
 0x102   : > { %v1097_v40 = vadd.f32 %v1081_v0, %v1014_v2  ;;  %1349 = vadd.xlane.f32.xlu2 %v1339_v38 }
 0x103   : > { %v1278_v6 = vpop.f32.mrf.mxu0 }
 0x104   : > { %v1291_v4 = vadd.f32 %v1275_v34, %v1097_v40 }
 0x106   : > { %v2174_v7 = vadd.f32 %v2145_v8, %v1291_v4  ;;  %v1001_v9 = vpop.f32.mrf.mxu2 }
 0x107   : > { %v1015_v13 = vadd.f32 %v1001_v9, %v932_v41 }
 0x108   : > { %1314 = vadd.xlane.f32.xlu1 %v2174_v7  ;;  %v920_v20 = vpop.f32.mrf.mxu1  ;;  %v1340_v12 = vmul.f32 %v2174_v7, %v2174_v7 }
 0x109   : > { %v1084_v10 = vpop.f32.mrf.mxu3  ;;  %v933_v19 = vadd.f32 %v920_v20, %v739_v16 }
 0x10a   : > { %v1098_v44 = vadd.f32 %v1084_v10, %v1015_v13 }
 0x10b   : > { %v1280_v22 = vpop.f32.mrf.mxu0 }
 0x10c   : > { %v1292_v39 = vadd.f32 %v1278_v6, %v1098_v44  ;;  %v1832_v6 = vmov 2048.0  }
 0x10d   : > { %1815 = vrcp.f32 %v1832_v6 }
 0x10e   : > { %v2185_v45 = vadd.f32 %v2145_v8, %v1292_v39  ;;  %v1003_v23 = vpop.f32.mrf.mxu2 }
 0x10f   : > { %v1016_v26 = vadd.f32 %v1003_v23, %v933_v19 }
 0x110   : > { %1351 = vadd.xlane.f32.xlu1 %v1340_v12  ;;  %1316 = vadd.xlane.f32.xlu2 %v2185_v45  ;;  %v1341_v17 = vmul.f32 %v2185_v45, %v2185_v45  ;;  %v923_v43 = vpop.f32.mrf.mxu1 }
 0x111   : > { %v1086_v24 = vpop.f32.mrf.mxu3  ;;  %v934_v30 = vadd.f32 %v923_v43, %v740_v29 }
 0x112   : > { %v1099_v48 = vadd.f32 %v1086_v24, %v1016_v26  ;;  %1353 = vadd.xlane.f32.xlu0 %v1341_v17  ;;  %v1833_v24 = vmov 2047.0  }
 0x113   : > { %v1283_v58 = vpop.f32.mrf.mxu0  ;;  %v1816_v13 = vpop.eup %1815  ;;  %1817 = vrcp.f32 %v1833_v24 }
 0x114   : > { %v1293_v28 = vadd.f32 %v1280_v22, %v1099_v48  ;;  %v1375_v39 = vmul.f32 2048.0, %v1816_v13  ;;  %vm1379_vm6 = vweird.f32 %v1816_v13 }
 0x116   : > { %v2196_v49 = vadd.f32 %v2145_v8, %v1293_v28  ;;  %v1006_v33 = vpop.f32.mrf.mxu2  ;;  %v1376_v25 = vsub.f32 1.0, %v1375_v39 }
 0x117   : > { %v1017_v57 = vadd.f32 %v1006_v33, %v934_v30 }
 0x118   : > { %1318 = vadd.xlane.f32.xlu1 %v2196_v49  ;;  %v925_v51 = vpop.f32.mrf.mxu1  ;;  %v1342_v47 = vmul.f32 %v2196_v49, %v2196_v49  ;;  %v1377_v48 = vmul.f32 %v1816_v13, %v1376_v25 }
 0x119   : > { %v1089_v52 = vpop.f32.mrf.mxu3  ;;  %v935_v18 = vadd.f32 %v925_v51, %v741_v55  ;;  %v1818_v27 = vpop.eup %1817 }
 0x11a   : > { %v1100_v21 = vadd.f32 %v1089_v52, %v1017_v57  ;;  %v1378_v54 = vadd.f32 %v1816_v13, %v1377_v48  ;;  %vm1390_vm7 = vweird.f32 %v1818_v27 }
 0x11b   : > { %v1285_v31 = vpop.f32.mrf.mxu0 }
 0x11c   : > { %v1294_v59 = vadd.f32 %v1283_v58, %v1100_v21  ;;  %v1386_v58 = vmul.f32 2047.0, %v1818_v27 }
 0x11e   : > { %v2204_v34 = vadd.f32 %v2145_v8, %v1294_v59  ;;  %v1008_v60 = vpop.f32.mrf.mxu2 }
 0x11f   : > { %v1018_v61 = vadd.f32 %v1008_v60, %v935_v18  ;;  %v1380_v18 = vsel %vm1379_vm6, %v1816_v13, %v1378_v54 }
 0x120   : > { %1355 = vadd.xlane.f32.xlu1 %v1342_v47  ;;  %1320 = vadd.xlane.f32.xlu0 %v2204_v34  ;;  %v1343_v0 = vmul.f32 %v2204_v34, %v2204_v34  ;;  %v1387_v47 = vsub.f32 1.0, %v1386_v58 }
 0x121   : > { %v1091_v56 = vpop.f32.mrf.mxu3 }
 0x122   : > { %v1101_v36 = vadd.f32 %v1091_v56, %v1018_v61  ;;  %v1388_v56 = vmul.f32 %v1818_v27, %v1387_v47 }
 0x124   : > { %v1295_v63 = vadd.f32 %v1285_v31, %v1101_v36 }
 0x126   : > { %v2208_v37 = vadd.f32 %v2145_v8, %v1295_v63 }
 0x128   : > { %1322 = vadd.xlane.f32.xlu2 %v2208_v37  ;;  %v1344_v53 = vmul.f32 %v2208_v37, %v2208_v37 }
 0x12a   : > { %1359 = vadd.xlane.f32.xlu0 %v1344_v53  ;;  %v1389_v53 = vadd.f32 %v1818_v27, %v1388_v56 }
 0x130   : > { %1357 = vadd.xlane.f32.xlu2 %v1343_v0 }
 0x163   : > { %v1309_v1 = vpop.xlane.xlu0 %1308 }
 0x165   : > { %v1346_v35 = vpop.xlane.xlu2 %1345 }
 0x16b   : > { %v1311_v50 = vpop.xlane.xlu0 %1310 }
 0x16c   : > { %v1324_v5 = vadd.f32 %v1311_v50, %v1309_v1  ;;  %v1391_v50 = vsel %vm1390_vm7, %v1818_v27, %v1389_v53 }
 0x173   : > { %v1313_v2 = vpop.xlane.xlu1 %1312  ;;  %v1348_v40 = vpop.xlane.xlu0 %1347 }
 0x174   : > { %v1325_v41 = vadd.f32 %v1324_v5, %v1313_v2  ;;  %v1361_v20 = vadd.f32 %v1348_v40, %v1346_v35 }
 0x175   : > { %v1350_v3 = vpop.xlane.xlu2 %1349 }
 0x176   : > { %v1362_v16 = vadd.f32 %v1361_v20, %v1350_v3 }
 0x17b   : > { %v1315_v38 = vpop.xlane.xlu1 %1314 }
 0x17c   : > { %v1326_v10 = vadd.f32 %v1325_v41, %v1315_v38 }
 0x183   : > { %v1352_v4 = vpop.xlane.xlu1 %1351  ;;  %v1317_v9 = vpop.xlane.xlu2 %1316 }
 0x184   : > { %v1327_v42 = vadd.f32 %v1326_v10, %v1317_v9  ;;  %v1363_v12 = vadd.f32 %v1362_v16, %v1352_v4  ;;  %v1813_v16 = vld [vmem:[%s2239_s3] ss:$0 sm:$0xff] }
 0x185   : > { %v1354_v8 = vpop.xlane.xlu0 %1353 }
 0x186   : > { %v1364_v43 = vadd.f32 %v1363_v12, %v1354_v8 }
 0x18b   : > { %v1319_v11 = vpop.xlane.xlu1 %1318 }
 0x18c   : > { %v1328_v15 = vadd.f32 %v1327_v42, %v1319_v11 }
 0x193   : > { %v1321_v44 = vpop.xlane.xlu0 %1320  ;;  %v1356_v17 = vpop.xlane.xlu1 %1355 }
 0x194   : > { %v1329_v19 = vadd.f32 %v1328_v15, %v1321_v44  ;;  %v1365_v28 = vadd.f32 %v1364_v43, %v1356_v17 }
 0x19b   : > { %v1323_v22 = vpop.xlane.xlu2 %1322 }
 0x19c   : > { %v1330_v23 = vadd.f32 %v1329_v19, %v1323_v22 }
 0x19d   : > { %v1360_v57 = vpop.xlane.xlu0 %1359 }
 0x19e   : > { %v1331_v26 = vrot.slane %v1330_v23, 4 }
 0x1a0   : > { %v1332_v46 = vadd.f32 %v1331_v26, %v1330_v23 }
 0x1a2   : > { %v1333_v29 = vrot.slane %v1332_v46, 2 }
 0x1a3   : > { %v1358_v30 = vpop.xlane.xlu2 %1357 }
 0x1a4   : > { %v1334_v33 = vadd.f32 %v1333_v29, %v1332_v46  ;;  %v1366_v52 = vadd.f32 %v1365_v28, %v1358_v30 }
 0x1a6   : > { %v1335_v21 = vrot.slane %v1334_v33, 1  ;;  %v1367_v51 = vadd.f32 %v1366_v52, %v1360_v57 }
 0x1a8   : > { %v1336_v59 = vadd.f32 %v1335_v21, %v1334_v33  ;;  %v1368_v55 = vrot.slane %v1367_v51, 4 }
 0x1aa   : > { %v1369_v60 = vadd.f32 %v1368_v55, %v1367_v51  ;;  %v1381_v61 = vmul.f32 %v1380_v18, %v1336_v59 }
 0x1ac   : > { %v1370_v36 = vrot.slane %v1369_v60, 2  ;;  %v1382_v31 = vmul.f32 2048.0, %v1381_v61  ;;  %v1408_v42 = vsub.f32 %v2148_v14, %v1381_v61  ;;  %v1409_v44 = vsub.f32 %v2155_v32, %v1381_v61  ;;  %v1814_v14 = vld [vmem:[%s2240_s4] ss:$0 sm:$0xff] }
 0x1ad   : > { %v1410_v15 = vsub.f32 %v2161_v62, %v1381_v61  ;;  %v1411_v39 = vsub.f32 %v2174_v7, %v1381_v61  ;;  %v1412_v22 = vsub.f32 %v2185_v45, %v1381_v61  ;;  %v1413_v12 = vsub.f32 %v2196_v49, %v1381_v61 }
 0x1ae   : > { %v1371_v63 = vadd.f32 %v1370_v36, %v1369_v60  ;;  %v1383_v1 = vmul.f32 %v1382_v31, %v1381_v61  ;;  %v1414_v23 = vsub.f32 %v2204_v34, %v1381_v61  ;;  %v1415_v24 = vsub.f32 %v2208_v37, %v1381_v61 }
 0x1b0   : > { %v1372_v0 = vrot.slane %v1371_v63, 1 }
 0x1b2   : > { %v1373_v2 = vadd.f32 %v1372_v0, %v1371_v63 }
 0x1b4   : > { %v1384_v38 = vsub.f32 %v1373_v2, %v1383_v1 }
 0x1b6   : > { %v1392_v35 = vmul.f32 %v1391_v50, %v1384_v38 }
 0x1b8   : > { %v1393_v40 = vmax.f32 %v1392_v35, 0.0 }
 0x1ba   : > { %1819 = vrsqrt.f32 %v1393_v40  ;;  %vm1401_vm8 = vcmp.eq.f32.partialorder %v1393_v40, inf  ;;  %v1404_v10 = vand.u32 2147483648, %v1393_v40  ;;  %vm1403_vm9 = vcmp.eq.f32.partialorder %v1393_v40, 0.0 }
 0x1c0   : > { %v1820_v3 = vpop.eup %1819 }
 0x1c1   : > { %v1395_v4 = vmul.f32 %v1820_v3, %v1393_v40 }
 0x1c3   : > { %v1396_v8 = vmul.f32 %v1820_v3, %v1395_v4 }
 0x1c5   : > { %v1397_v5 = vmul.f32 0.5, %v1396_v8 }
 0x1c7   : > { %v1398_v6 = vsub.f32 1.5, %v1397_v5 }
 0x1c9   : > { %v1399_v41 = vmul.f32 %v1820_v3, %v1398_v6 }
 0x1cb   : > { %v1400_v9 = vmul.f32 %v1399_v41, %v1393_v40 }
 0x1cd   : > { %v1402_v11 = vsel %vm1401_vm8, %v1393_v40, %v1400_v9 }
 0x1ce   : > { %v1405_v13 = vsel %vm1403_vm9, %v1404_v10, %v1402_v11 }
 0x1cf   : > { %v1406_v20 = vadd.f32 1e-05, %v1405_v13 }
 0x1d1   : > { %1821 = vrcp.f32 %v1406_v20 }
 0x1d7   : > { %v1822_v19 = vpop.eup %1821 }
 0x1d8   : > { %v1416_v32 = vmul.f32 %v1822_v19, %v1408_v42  ;;  %v1417_v62 = vmul.f32 %v1822_v19, %v1409_v44  ;;  %v1418_v7 = vmul.f32 %v1822_v19, %v1410_v15  ;;  %v1419_v25 = vmul.f32 %v1822_v19, %v1411_v39 }
 0x1d9   : > { %v1420_v26 = vmul.f32 %v1822_v19, %v1412_v22  ;;  %v1421_v17 = vmul.f32 %v1822_v19, %v1413_v12  ;;  %v1422_v43 = vmul.f32 %v1822_v19, %v1414_v23  ;;  %v1423_v46 = vmul.f32 %v1822_v19, %v1415_v24 }
 0x1da   : > { %v1428_v45 = vmul.f32 %v1813_v16, %v1416_v32  ;;  %v1429_v48 = vmul.f32 %v1813_v16, %v1417_v62  ;;  %v1430_v49 = vmul.f32 %v1813_v16, %v1418_v7  ;;  %v1431_v27 = vmul.f32 %v1813_v16, %v1419_v25 }
 0x1db   : > { %v1432_v34 = vmul.f32 %v1813_v16, %v1420_v26  ;;  %v1433_v28 = vmul.f32 %v1813_v16, %v1421_v17  ;;  %v1434_v37 = vmul.f32 %v1813_v16, %v1422_v43  ;;  %v1435_v29 = vmul.f32 %v1813_v16, %v1423_v46 }
 0x1dc   : > { %v1440_v30 = vadd.f32 %v1814_v14, %v1428_v45  ;;  %v1441_v33 = vadd.f32 %v1814_v14, %v1429_v48  ;;  %v1442_v52 = vadd.f32 %v1814_v14, %v1430_v49  ;;  %v1443_v54 = vadd.f32 %v1814_v14, %v1431_v27 }
 0x1dd   : > { %v1444_v57 = vadd.f32 %v1814_v14, %v1432_v34  ;;  %v1445_v58 = vadd.f32 %v1814_v14, %v1433_v28  ;;  %v1446_v21 = vadd.f32 %v1814_v14, %v1434_v37  ;;  %v1447_v51 = vadd.f32 %v1814_v14, %v1435_v29 }
 0x1de   : > { %v1448_v59 = vmax.f32 %v1440_v30, 0.0  ;;  %v1449_v55 = vmax.f32 %v1441_v33, 0.0  ;;  %v1450_v18 = vmax.f32 %v1442_v52, 0.0  ;;  %v1451_v47 = vmax.f32 %v1443_v54, 0.0 }
 0x1df   : > { %v1452_v60 = vmax.f32 %v1444_v57, 0.0  ;;  %v1453_v61 = vmax.f32 %v1445_v58, 0.0  ;;  %v1454_v56 = vmax.f32 %v1446_v21, 0.0  ;;  %v1455_v36 = vmax.f32 %v1447_v51, 0.0 }
 0x1e0   : > { %v1777_v31 = vpack.c.bf16 %v1449_v55, %v1448_v59  ;;  %v1782_v63 = vpack.c.bf16 %v1451_v47, %v1450_v18 }
 0x1e1   : > { %v1787_v53 = vpack.c.bf16 %v1453_v61, %v1452_v60  ;;  %v1792_v0 = vpack.c.bf16 %v1455_v36, %v1454_v56 }
 0x1e2   : > { %1778 = vst [vmem:[%s224_s28] sm:$0xff] %v1777_v31  }
 0x1e3   : > { %1794 = vst [vmem:[%s224_s28 + $0x8] sm:$0xff] %v1782_v63  }
 0x1e4   : > { %1795 = vst [vmem:[%s224_s28 + $0x10] sm:$0xff] %v1787_v53  }
 0x1e5   : > { %1796 = vst [vmem:[%s224_s28 + $0x18] sm:$0xff] %v1792_v0  }
 0x1e6 PF: > { %s15_s18 = sadd.s32 1, %s1829_s18  }
 0x1e7   : > { %p12_p4 = scmp.ge.s32.totalorder %s15_s18, 4  }
 0x1e9   :  { %14 = sbr.rel (!%p12_p4) target bundleno = 1 (0x1), region = 83 }

// kernel: content_encoder.3
= control target key start
LH: loop header
LB: loop body
LE: loop exit
PB: predicated region body
PF: predicated region fallthrough
CT: control target
= control target key end

     0   :  { %s2103_s18 = smov 0   ;;  %s2467_s0 = inlined_call_operand.vmem [shape: bf16[2,4,5,5,128], index: 0, kind: input, shape index: {}]   ;;  %s2468_s1 = inlined_call_operand.vmem [shape: bf16[9,128,128], index: 1, kind: input, shape index: {}]   ;;  %s2469_s2 = inlined_call_operand.vmem [shape: f32[1,128], index: 2, kind: input, shape index: {}]   ;;  %s2470_s3 = inlined_call_operand.vmem [shape: f32[1,128], index: 3, kind: input, shape index: {}]   ;;  %s2471_s4 = inlined_call_operand.vmem [shape: f32[1,128], index: 4, kind: input, shape index: {}]   ;;  %s2472_s5 = inlined_call_operand.vmem [shape: bf16[2,16,128], index: 5, kind: output, shape index: {}]  }
   0x1 LB: > { %s1509_s19 = sadd.s32 4294967295, %s2069_s18   ;;  %p1513_p0 = scmp.ge.s32.totalorder %s2069_s18, 1  ;;  %s2069_s18 = sphi %s2103_s18, %s15_s18  }
   0x2   : > { %p187_p1 = scmp.lt.s32.totalorder %s2069_s18, 3 }
   0x4   : > { %p188_p2 = pnand %p1513_p0, %p187_p1 }
   0x5   : > { %p215_p3 = scmp.lt.s32.totalorder (!%p188_p2), %s1509_s19, 1 }
   0x6   : > { %191 = sbr.rel (%p188_p2) target bundleno = 439 (0x1b7), region = 40 }
   0xb   : > { %v1979_v0 = vld [vmem:[%s2468_s1 + $0x78] sm:$0xff]  ;;  %v1978_v3 = vld [vmem:[%s2468_s1 + $0x70] sm:$0xff]  ;;  %s2480_s19 = smov (!%p215_p3, %s1509_s19), 1  ;;  %v1977_v8 = vld [vmem:[%s2468_s1 + $0x68] sm:$0xff]  ;;  %vm455_vm0 = vsmask.f32 1280 }
   0xc   : > { %v1987_v1 = vld [vmem:[%s2468_s1 + $0xb8] sm:$0xff]  ;;  %328 = vmatpush.bf16.msra.mxu0 %v1979_v0  ;;  %v1986_v4 = vld [vmem:[%s2468_s1 + $0xb0] sm:$0xff]  ;;  %v1985_v9 = vld [vmem:[%s2468_s1 + $0xa8] sm:$0xff]  ;;  %s2041_s21 = smul.u32 80, %s2480_s19  ;;  %vm429_vm1 = vcmask 1041408   ;;  %vm433_vm3 = vcmask 1043458  }
   0xd   : > { %v1971_v2 = vld [vmem:[%s2468_s1 + $0x38] sm:$0xff]  ;;  %592 = vmatpush.bf16.msra.mxu2 %v1987_v1  ;;  %v1970_v6 = vld [vmem:[%s2468_s1 + $0x30] sm:$0xff]  ;;  %v1969_v10 = vld [vmem:[%s2468_s1 + $0x28] sm:$0xff]  ;;  %vm456_vm2 = vsmask.f32 3336  ;;  %s1963_s15 = sshll.u32 %s2480_s19, 3 }
   0xe   : > { %v1995_v5 = vld [vmem:[%s2468_s1 + $0xf8] sm:$0xff]  ;;  %403 = vmatpush.bf16.msra.mxu1 %v1971_v2  ;;  %v1994_v7 = vld [vmem:[%s2468_s1 + $0xf0] sm:$0xff]  ;;  %v1993_v11 = vld [vmem:[%s2468_s1 + $0xe8] sm:$0xff]  ;;  %s2165_s7 = scalar_lea.vmem %s2467_s0, %s2041_s21  ;;  %vm458_vm4 = vsmask.f32 5392  ;;  %s224_s20 = scalar_lea.vmem %s2472_s5, %s1963_s15 }
   0xf   : > { %691 = vmatpush.bf16.msra.mxu3 %v1995_v5  ;;  %v1976_v12 = vld [vmem:[%s2468_s1 + $0x60] sm:$0xff]  ;;  %v1975_v16 = vld [vmem:[%s2468_s1 + $0x58] sm:$0xff]  ;;  %v1517_v20 = vld [vmem:[%s2165_s7 + $0x14] sm:$0x3]  ;;  %vm460_vm5 = vsmask.f32 7448 }
  0x10   : > { %329 = vmatpush.bf16.msra.mxu0 %v1978_v3  ;;  %v1984_v13 = vld [vmem:[%s2468_s1 + $0xa0] sm:$0xff]  ;;  %v1983_v17 = vld [vmem:[%s2468_s1 + $0x98] sm:$0xff]  ;;  %268 = vst [vmem:[#allocation1] ss:$4 sm:$0xff] %v1517_v20  ;;  %v1974_v24 = vld [vmem:[%s2468_s1 + $0x50] sm:$0xff] }
  0x11   : > { %593 = vmatpush.bf16.msra.mxu2 %v1986_v4  ;;  %v1968_v14 = vld [vmem:[%s2468_s1 + $0x20] sm:$0xff]  ;;  %v1967_v18 = vld [vmem:[%s2468_s1 + $0x18] sm:$0xff]  ;;  %v1982_v25 = vld [vmem:[%s2468_s1 + $0x90] sm:$0xff] }
  0x12   : > { %404 = vmatpush.bf16.msra.mxu1 %v1970_v6  ;;  %v1992_v15 = vld [vmem:[%s2468_s1 + $0xe0] sm:$0xff]  ;;  %v1991_v19 = vld [vmem:[%s2468_s1 + $0xd8] sm:$0xff]  ;;  %v1966_v26 = vld [vmem:[%s2468_s1 + $0x10] sm:$0xff] }
  0x13   : > { %692 = vmatpush.bf16.msra.mxu3 %v1994_v7  ;;  %v1518_v21 = vld [vmem:[%s2165_s7 + $0x18] sm:$0x3]  ;;  %v1519_v22 = vld [vmem:[%s2165_s7 + $0x1c] sm:$0x3]  ;;  %v1520_v23 = vld [vmem:[%s2165_s7 + $0x20] sm:$0x3] }
  0x14   : > { %330 = vmatpush.bf16.msra.mxu0 %v1977_v8  ;;  %271 = vst [vmem:[#allocation1 + $0x1] ss:$4 sm:$0xff] %v1518_v21  ;;  %v1990_v27 = vld [vmem:[%s2468_s1 + $0xd0] sm:$0xff]  ;;  %v417_v28 = vld [vmem:[%s2165_s7] sm:$0x7]  ;;  %v1973_v35 = vld [vmem:[%s2468_s1 + $0x48] sm:$0xff] }
  0x15   : > { %594 = vmatpush.bf16.msra.mxu2 %v1985_v9  ;;  %274 = vst [vmem:[#allocation1 + $0x2] ss:$4 sm:$0xff] %v1519_v22  ;;  %v418_v29 = vld [vmem:[%s2165_s7 + $0x4] sm:$0x7]  ;;  %v419_v30 = vld [vmem:[%s2165_s7 + $0x8] sm:$0x7]  ;;  %vm2243_vm6 = vmor %vm455_vm0, %vm456_vm2 }
  0x16   : > { %405 = vmatpush.bf16.msra.mxu1 %v1969_v10  ;;  %277 = vst [vmem:[#allocation1 + $0x3] ss:$4 sm:$0xff] %v1520_v23  ;;  %v420_v31 = vld [vmem:[%s2165_s7 + $0xc] sm:$0x7]  ;;  %v425_v32 = vrot.slane %v417_v28, 2  ;;  %v426_v33 = vrot.slane %v418_v29, 2  ;;  %vm2253_vm7 = vmor %vm2243_vm6, %vm458_vm4 }
  0x17   : > { %693 = vmatpush.bf16.msra.mxu3 %v1993_v11  ;;  %v427_v34 = vrot.slane %v419_v30, 2  ;;  %v1981_v36 = vld [vmem:[%s2468_s1 + $0x88] sm:$0xff]  ;;  %v225_v37 = vld [vmem:[%s2165_s7] sm:$0x3]  ;;  %v428_v38 = vrot.slane %v420_v31, 2  ;;  %v2003_v54 = vld [vmem:[%s2468_s1 + $0x138] sm:$0xff] }
  0x18   : > { %331 = vmatpush.bf16.msra.mxu0 %v1976_v12  ;;  %v432_v39 = vsel %vm429_vm1, %v417_v28, %v425_v32  ;;  %v434_v40 = vsel %vm433_vm3, %v417_v28, %v425_v32  ;;  %v1965_v41 = vld [vmem:[%s2468_s1 + $0x8] sm:$0xff]  ;;  %v226_v42 = vld [vmem:[%s2165_s7 + $0x4] sm:$0x3]  ;;  %v439_v44 = vsel %vm429_vm1, %v418_v29, %v426_v33  ;;  %v440_v45 = vsel %vm433_vm3, %v418_v29, %v426_v33  ;;  %v2019_v60 = vld [vmem:[%s2468_s1 + $0x1b8] sm:$0xff] }
  0x19   : > { %595 = vmatpush.bf16.msra.mxu2 %v1984_v13  ;;  %v436_v43 = vrot.slane %v434_v40, 2  ;;  %v446_v46 = vsel %vm433_vm3, %v419_v30, %v427_v34  ;;  %v1972_v47 = vld [vmem:[%s2468_s1 + $0x40] sm:$0xff]  ;;  %v1989_v49 = vld [vmem:[%s2468_s1 + $0xc8] sm:$0xff]  ;;  %v442_v51 = vrot.slane %v440_v45, 2  ;;  %v445_v52 = vsel %vm429_vm1, %v419_v30, %v427_v34  ;;  %v2011_v61 = vld [vmem:[%s2468_s1 + $0x178] sm:$0xff] }
  0x1a   : > { %406 = vmatpush.bf16.msra.mxu1 %v1968_v14  ;;  %v1980_v48 = vld [vmem:[%s2468_s1 + $0x80] sm:$0xff]  ;;  %v227_v50 = vld [vmem:[%s2165_s7 + $0x8] sm:$0x3]  ;;  %v452_v53 = vsel %vm433_vm3, %v420_v31, %v428_v38  ;;  %v228_v56 = vld [vmem:[%s2165_s7 + $0xc] sm:$0x3]  ;;  %v448_v57 = vrot.slane %v446_v46, 2  ;;  %v451_v63 = vsel %vm429_vm1, %v420_v31, %v428_v38 }
  0x1b   : > { %694 = vmatpush.bf16.msra.mxu3 %v1992_v15  ;;  %v1964_v55 = vld [vmem:[%s2468_s1] sm:$0xff]  ;;  %v462_v58 = vshrl.u32 %v432_v39, 16  ;;  %v465_v59 = vshll.u32 %v432_v39, 16  ;;  %v454_v0 = vrot.slane %v452_v53, 2  ;;  %v475_v2 = vshrl.u32 %v439_v44, 16  ;;  %v2002_v23 = vld [vmem:[%s2468_s1 + $0x130] sm:$0xff]  ;;  %vm2272_vm8 = vmor %vm2253_vm7, %vm460_vm5 }
  0x1c   : > { %332 = vmatpush.bf16.msra.mxu0 %v1975_v16  ;;  %v478_v3 = vshll.u32 %v439_v44, 16  ;;  %v471_v6 = vshll.u32 %v436_v43, 16  ;;  %v488_v7 = vshrl.u32 %v445_v52, 16  ;;  %v484_v10 = vshll.u32 %v442_v51, 16  ;;  %v1988_v12 = vld [vmem:[%s2468_s1 + $0xc0] sm:$0xff]  ;;  %v2010_v28 = vld [vmem:[%s2468_s1 + $0x170] sm:$0xff] }
  0x1d   : > { %596 = vmatpush.bf16.msra.mxu2 %v1983_v17  ;;  %v278_v62 = vld.sshfl [vmem:[#allocation1] sm:$0xff pattern:$0x73625140]  ;;  %v464_v4 = vrot.slane %v462_v58, 6  ;;  %v467_v5 = vrot.slane %v465_v59, 7  ;;  %v477_v8 = vrot.slane %v475_v2, 6 }
  0x1e   : > { %407 = vmatpush.bf16.msra.mxu1 %v1967_v18  ;;  %343 = vst [vmem:[#allocation1] ss:$4 sm:$0xff] %v225_v37  ;;  %v480_v9 = vrot.slane %v478_v3, 7  ;;  %v491_v11 = vshll.u32 %v445_v52, 16  ;;  %v490_v15 = vrot.slane %v488_v7, 6  ;;  %v497_v16 = vshll.u32 %v448_v57, 16 }
  0x1f   : > { %695 = vmatpush.bf16.msra.mxu3 %v1991_v19  ;;  %346 = vst [vmem:[#allocation1 + $0x1] ss:$4 sm:$0xff] %v226_v42  ;;  %v468_v14 = vor.u32 %v467_v5, %v464_v4  ;;  %v501_v17 = vshrl.u32 %v451_v63, 16  ;;  %v2027_v18 = vld [vmem:[%s2468_s1 + $0x1f8] sm:$0xff]  ;;  %v504_v21 = vshll.u32 %v451_v63, 16  ;;  %v510_v22 = vshll.u32 %v454_v0, 16 }
  0x20   : > { %333 = vmatpush.bf16.msra.mxu0 %v1974_v24  ;;  %349 = vst [vmem:[#allocation1 + $0x2] ss:$4 sm:$0xff] %v227_v50  ;;  %v481_v19 = vor.u32 %v480_v9, %v477_v8  ;;  %v493_v20 = vrot.slane %v491_v11, 7  ;;  %v486_v31 = vrot.slane %v484_v10, 7  ;;  %v499_v34 = vrot.slane %v497_v16, 7  ;;  %v2001_v39 = vld [vmem:[%s2468_s1 + $0x128] sm:$0xff] }
  0x21   : > { %597 = vmatpush.bf16.msra.mxu2 %v1982_v25  ;;  %352 = vst [vmem:[#allocation1 + $0x3] ss:$4 sm:$0xff] %v228_v56  ;;  %v469_v24 = vrot.slane %v468_v14, 2  ;;  %v473_v25 = vrot.slane %v471_v6, 7  ;;  %v506_v33 = vrot.slane %v504_v21, 7  ;;  %v512_v38 = vrot.slane %v510_v22, 7 }
  0x22   : > { %408 = vmatpush.bf16.msra.mxu1 %v1966_v26  ;;  %v503_v26 = vrot.slane %v501_v17, 6  ;;  %v482_v30 = vrot.slane %v481_v19, 2  ;;  %v494_v32 = vor.u32 %v493_v20, %v490_v15  ;;  %v2009_v42 = vld [vmem:[%s2468_s1 + $0x168] sm:$0xff]  ;;  %v2016_v50 = vld [vmem:[%s2468_s1 + $0x1a0] sm:$0xff]  ;;  %v2015_v56 = vld [vmem:[%s2468_s1 + $0x198] sm:$0xff] }
  0x23   : > { %696 = vmatpush.bf16.msra.mxu3 %v1990_v27  ;;  %v2018_v27 = vld [vmem:[%s2468_s1 + $0x1b0] sm:$0xff]  ;;  %v474_v40 = vsel %vm2272_vm8, %v469_v24, %v473_v25  ;;  %v2008_v51 = vld [vmem:[%s2468_s1 + $0x160] sm:$0xff]  ;;  %v1753_v53 = vld [vmem:[%s2165_s7 + $0x28] sm:$0x7] }
  0x24   : > { %334 = vmatpush.bf16.msra.mxu0 %v1973_v35  ;;  %v2026_v35 = vld [vmem:[%s2468_s1 + $0x1f0] sm:$0xff]  ;;  %v507_v37 = vor.u32 %v506_v33, %v503_v26  ;;  %v487_v43 = vsel %vm2272_vm8, %v482_v30, %v486_v31  ;;  %v2024_v52 = vld [vmem:[%s2468_s1 + $0x1e0] sm:$0xff]  ;;  %v2007_v57 = vld [vmem:[%s2468_s1 + $0x158] sm:$0xff] }
  0x25   : > { %598 = vmatpush.bf16.msra.mxu2 %v1981_v36  ;;  %v495_v36 = vrot.slane %v494_v32, 2  ;;  %v1755_v58 = vld [vmem:[%s2165_s7 + $0x30] sm:$0x7]  ;;  %v1756_v59 = vld [vmem:[%s2165_s7 + $0x34] sm:$0x7]  ;;  %v2013_v14 = vld [vmem:[%s2468_s1 + $0x188] sm:$0xff] }
  0x26   : > { %409 = vmatpush.bf16.msra.mxu1 %v1965_v41  ;;  %v2017_v41 = vld [vmem:[%s2468_s1 + $0x1a8] sm:$0xff]  ;;  %v508_v44 = vrot.slane %v507_v37, 2  ;;  %v1651_v1 = vld [vmem:[%s2165_s7 + $0x30] sm:$0x3]  ;;  %v816_v3 = vrot.slane %v1755_v58, 2  ;;  %v817_v7 = vrot.slane %v1756_v59, 2 }
  0x27   : > { %697 = vmatpush.bf16.msra.mxu3 %v1989_v49  ;;  %v500_v46 = vsel %vm2272_vm8, %v495_v36, %v499_v34  ;;  %v2000_v49 = vld [vmem:[%s2468_s1 + $0x120] sm:$0xff]  ;;  %v1650_v0 = vld [vmem:[%s2165_s7 + $0x2c] sm:$0x3]  ;;  %v1998_v2 = vld [vmem:[%s2468_s1 + $0x110] sm:$0xff] }
  0x28   : > { %335 = vmatpush.bf16.msra.mxu0 %v1972_v47  ;;  %v353_v45 = vld.sshfl [vmem:[#allocation1] sm:$0xff pattern:$0x73625140]  ;;  %v513_v47 = vsel %vm2272_vm8, %v508_v44, %v512_v38  ;;  %v2014_v5 = vld [vmem:[%s2468_s1 + $0x190] sm:$0xff]  ;;  %v832_v13 = vsel %vm429_vm1, %v1755_v58, %v816_v3  ;;  %v2005_v15 = vld [vmem:[%s2468_s1 + $0x148] sm:$0xff]  ;;  %v838_v16 = vsel %vm429_vm1, %v1756_v59, %v817_v7  ;;  %v839_v34 = vsel %vm433_vm3, %v1756_v59, %v817_v7 }
  0x29   : > { %599 = vmatpush.bf16.msra.mxu2 %v1980_v48  ;;  %532 = vst [vmem:[#allocation1] ss:$4 sm:$0xff] %v474_v40  ;;  %v2025_v48 = vld [vmem:[%s2468_s1 + $0x1e8] sm:$0xff]  ;;  %v2006_v6 = vld [vmem:[%s2468_s1 + $0x150] sm:$0xff]  ;;  %v871_v24 = vshll.u32 %v832_v13, 16  ;;  %v1996_v25 = vld [vmem:[%s2468_s1 + $0x100] sm:$0xff] }
  0x2a   : > { %410 = vmatpush.bf16.msra.mxu1 %v1964_v55  ;;  %535 = vst [vmem:[#allocation1 + $0x1] ss:$4 sm:$0xff] %v487_v43  ;;  %v1754_v55 = vld [vmem:[%s2165_s7 + $0x2c] sm:$0x7]  ;;  %v1652_v8 = vld [vmem:[%s2165_s7 + $0x34] sm:$0x3] }
  0x2b   : > { %698 = vmatpush.bf16.msra.mxu3 %v1988_v12  ;;  %336 = vmatmul.bf16.vlgmr.msra.gmra.mxu0 %v278_v62  ;;  %538 = vst [vmem:[#allocation1 + $0x2] ss:$4 sm:$0xff] %v500_v46  ;;  %v2023_v62 = vld [vmem:[%s2468_s1 + $0x1d8] sm:$0xff]  ;;  %v815_v63 = vrot.slane %v1754_v55, 2  ;;  %v2022_v10 = vld [vmem:[%s2468_s1 + $0x1d0] sm:$0xff]  ;;  %v1997_v12 = vld [vmem:[%s2468_s1 + $0x108] sm:$0xff] }
  0x2c   : > { %790 = vmatpush.bf16.msrb.mxu0 %v2003_v54  ;;  %541 = vst [vmem:[#allocation1 + $0x3] ss:$4 sm:$0xff] %v513_v47  ;;  %v1999_v54 = vld [vmem:[%s2468_s1 + $0x118] sm:$0xff]  ;;  %v2012_v26 = vld [vmem:[%s2468_s1 + $0x180] sm:$0xff]  ;;  %v884_v30 = vshll.u32 %v838_v16, 16  ;;  %v841_v47 = vrot.slane %v839_v34, 2 }
  0x2d   : > { %1071 = vmatpush.bf16.msrb.mxu2 %v2019_v60  ;;  %411 = vmatmul.bf16.vlgmr.msra.gmra.mxu1 %v353_v45  ;;  %v814_v60 = vrot.slane %v1753_v53, 2  ;;  %v826_v11 = vsel %vm429_vm1, %v1754_v55, %v815_v63  ;;  %v827_v22 = vsel %vm433_vm3, %v1754_v55, %v815_v63  ;;  %v2035_v31 = vld [vmem:[%s2468_s1 + $0x238] sm:$0xff]  ;;  %v2004_v37 = vld [vmem:[%s2468_s1 + $0x140] sm:$0xff]  ;;  %v873_v45 = vrot.slane %v871_v24, 7 }
  0x2e   : > { %972 = vmatpush.bf16.msrb.mxu1 %v2011_v61  ;;  %v1649_v61 = vld [vmem:[%s2165_s7 + $0x28] sm:$0x3]  ;;  %v855_v20 = vshrl.u32 %v826_v11, 16  ;;  %v858_v21 = vshll.u32 %v826_v11, 16  ;;  %v1701_v32 = vld [vmem:[%s2165_s7 + $0x3c] sm:$0x3] }
  0x2f   : > { %1170 = vmatpush.bf16.msrb.mxu3 %v2027_v18  ;;  %v820_v9 = vsel %vm429_vm1, %v1753_v53, %v814_v60  ;;  %v821_v19 = vsel %vm433_vm3, %v1753_v53, %v814_v60  ;;  %v1702_v38 = vld [vmem:[%s2165_s7 + $0x40] sm:$0x3]  ;;  %v2021_v53 = vld [vmem:[%s2468_s1 + $0x1c8] sm:$0xff]  ;;  %v1909_v11 = vld [vmem:[%s2165_s7 + $0x4] sm:$0x7] }
  0x30   : > { %791 = vmatpush.bf16.msrb.mxu0 %v2002_v23  ;;  %v842_v17 = vshrl.u32 %v820_v9, 16  ;;  %v845_v18 = vshll.u32 %v820_v9, 16  ;;  %v868_v23 = vshrl.u32 %v832_v13, 16  ;;  %v823_v33 = vrot.slane %v821_v19, 2  ;;  %v2020_v59 = vld [vmem:[%s2468_s1 + $0x1c0] sm:$0xff] }
  0x31   : > { %1072 = vmatpush.bf16.msrb.mxu2 %v2018_v27  ;;  %v833_v27 = vsel %vm433_vm3, %v1755_v58, %v816_v3  ;;  %v857_v40 = vrot.slane %v855_v20, 6 }
  0x32   : > { %973 = vmatpush.bf16.msrb.mxu1 %v2010_v28  ;;  %v881_v28 = vshrl.u32 %v838_v16, 16  ;;  %v847_v36 = vrot.slane %v845_v18, 7  ;;  %v835_v43 = vrot.slane %v833_v27, 2  ;;  %v870_v44 = vrot.slane %v868_v23, 6  ;;  %v1912_v16 = vld [vmem:[%s2165_s7 + $0x10] sm:$0x7] }
  0x33   : > { %1171 = vmatpush.bf16.msrb.mxu3 %v2026_v35  ;;  %v542_v4 = vld.sshfl [vmem:[#allocation1] sm:$0xff pattern:$0x73625140]  ;;  %v844_v35 = vrot.slane %v842_v17, 6  ;;  %v1194_v17 = vrot.slane %v1909_v11, 2  ;;  %v1197_v20 = vrot.slane %v1912_v16, 2 }
  0x34   : > { %792 = vmatpush.bf16.msrb.mxu0 %v2001_v39  ;;  %600 = vmatmul.bf16.vlgmr.msra.gmra.mxu2 %v542_v4  ;;  %631 = vst [vmem:[#allocation1] ss:$4 sm:$0xff] %v1649_v61  ;;  %v829_v39 = vrot.slane %v827_v22, 2  ;;  %v877_v58 = vshll.u32 %v835_v43, 16  ;;  %v890_v61 = vshll.u32 %v841_v47, 16 }
  0x35   : > { %1073 = vmatpush.bf16.msrb.mxu2 %v2017_v41  ;;  %634 = vst [vmem:[#allocation1 + $0x1] ss:$4 sm:$0xff] %v1650_v0  ;;  %v860_v41 = vrot.slane %v858_v21, 7  ;;  %v1200_v21 = vsel %vm429_vm1, %v1909_v11, %v1194_v17  ;;  %v1201_v22 = vsel %vm433_vm3, %v1909_v11, %v1194_v17 }
  0x36   : > { %974 = vmatpush.bf16.msrb.mxu1 %v2009_v42  ;;  %637 = vst [vmem:[#allocation1 + $0x2] ss:$4 sm:$0xff] %v1651_v1  ;;  %v1703_v42 = vld [vmem:[%s2165_s7 + $0x44] sm:$0x3]  ;;  %v864_v55 = vshll.u32 %v829_v39, 16  ;;  %v879_v4 = vrot.slane %v877_v58, 7 }
  0x37   : > { %1172 = vmatpush.bf16.msrb.mxu3 %v2025_v48  ;;  %640 = vst [vmem:[#allocation1 + $0x3] ss:$4 sm:$0xff] %v1652_v8  ;;  %v883_v48 = vrot.slane %v881_v28, 6  ;;  %v1222_v34 = vshrl.u32 %v1200_v21, 16 }
  0x38   : > { %793 = vmatpush.bf16.msrb.mxu0 %v2000_v49  ;;  %v886_v49 = vrot.slane %v884_v30, 7  ;;  %v866_v1 = vrot.slane %v864_v55, 7  ;;  %v2029_v55 = vld [vmem:[%s2468_s1 + $0x208] sm:$0xff] }
  0x39   : > { %1074 = vmatpush.bf16.msrb.mxu2 %v2016_v50  ;;  %v1704_v50 = vld [vmem:[%s2165_s7 + $0x48] sm:$0x3] }
  0x3a   : > { %975 = vmatpush.bf16.msrb.mxu1 %v2008_v51  ;;  %v848_v51 = vor.u32 %v847_v36, %v844_v35  ;;  %v887_v60 = vor.u32 %v886_v49, %v883_v48  ;;  %v1805_v35 = vld [vmem:[%s2165_s7 + $0x4] sm:$0x3] }
  0x3b   : > { %1173 = vmatpush.bf16.msrb.mxu3 %v2024_v52  ;;  %v851_v52 = vshll.u32 %v823_v33, 16  ;;  %v1219_v33 = vsel %vm433_vm3, %v1912_v16, %v1197_v20 }
  0x3c   : > { %794 = vmatpush.bf16.msrb.mxu0 %v1999_v54  ;;  %v861_v54 = vor.u32 %v860_v41, %v857_v40  ;;  %v1221_v36 = vrot.slane %v1219_v33, 2  ;;  %v2030_v40 = vld [vmem:[%s2468_s1 + $0x210] sm:$0xff]  ;;  %v1806_v41 = vld [vmem:[%s2165_s7 + $0x8] sm:$0x3] }
  0x3d   : > { %1075 = vmatpush.bf16.msrb.mxu2 %v2015_v56  ;;  %v2034_v56 = vld [vmem:[%s2468_s1 + $0x230] sm:$0xff]  ;;  %v853_v63 = vrot.slane %v851_v52, 7 }
  0x3e   : > { %976 = vmatpush.bf16.msrb.mxu1 %v2007_v57  ;;  %v641_v46 = vld.sshfl [vmem:[#allocation1] sm:$0xff pattern:$0x73625140]  ;;  %v874_v57 = vor.u32 %v873_v45, %v870_v44  ;;  %v862_v0 = vrot.slane %v861_v54, 2 }
  0x3f   : > { %1174 = vmatpush.bf16.msrb.mxu3 %v2023_v62  ;;  %730 = vst [vmem:[#allocation1] ss:$4 sm:$0xff] %v1701_v32  ;;  %v849_v62 = vrot.slane %v848_v51, 2  ;;  %v1218_v32 = vsel %vm429_vm1, %v1912_v16, %v1197_v20  ;;  %v1858_v16 = vld [vmem:[%s2165_s7 + $0x1c] sm:$0x3] }
  0x40   : > { %795 = vmatpush.bf16.msrb.mxu0 %v1998_v2  ;;  %699 = vmatmul.bf16.vlgmr.msra.gmra.mxu3 %v641_v46  ;;  %733 = vst [vmem:[#allocation1 + $0x1] ss:$4 sm:$0xff] %v1702_v38  ;;  %v2033_v2 = vld [vmem:[%s2468_s1 + $0x228] sm:$0xff]  ;;  %v875_v3 = vrot.slane %v874_v57, 2  ;;  %v867_v8 = vsel %vm2272_vm8, %v862_v0, %v866_v1  ;;  %v1270_v0 = vshll.u32 %v1221_v36, 16 }
  0x41   : > { %1076 = vmatpush.bf16.msrb.mxu2 %v2014_v5  ;;  %736 = vst [vmem:[#allocation1 + $0x2] ss:$4 sm:$0xff] %v1703_v42  ;;  %v888_v5 = vrot.slane %v887_v60, 2  ;;  %v854_v7 = vsel %vm2272_vm8, %v849_v62, %v853_v63  ;;  %v1224_v42 = vrot.slane %v1222_v34, 6  ;;  %v1807_v46 = vld [vmem:[%s2165_s7 + $0xc] sm:$0x3] }
  0x42   : > { %977 = vmatpush.bf16.msrb.mxu1 %v2006_v6  ;;  %739 = vst [vmem:[#allocation1 + $0x3] ss:$4 sm:$0xff] %v1704_v50  ;;  %v892_v6 = vrot.slane %v890_v61, 7  ;;  %v1808_v50 = vld [vmem:[%s2165_s7 + $0x10] sm:$0x3]  ;;  %v1264_v60 = vshll.u32 %v1218_v32, 16 }
  0x43   : > { %1175 = vmatpush.bf16.msrb.mxu3 %v2022_v10  ;;  %v880_v10 = vsel %vm2272_vm8, %v875_v3, %v879_v4 }
  0x44   : > { %796 = vmatpush.bf16.msrb.mxu0 %v1997_v12  ;;  %v2032_v12 = vld [vmem:[%s2468_s1 + $0x220] sm:$0xff]  ;;  %v893_v13 = vsel %vm2272_vm8, %v888_v5, %v892_v6  ;;  %v1266_v4 = vrot.slane %v1264_v60, 7 }
  0x45   : > { %1077 = vmatpush.bf16.msrb.mxu2 %v2013_v14  ;;  %v1910_v14 = vld [vmem:[%s2165_s7 + $0x8] sm:$0x7] }
  0x46   : > { %978 = vmatpush.bf16.msrb.mxu1 %v2005_v15  ;;  %v1911_v15 = vld [vmem:[%s2165_s7 + $0xc] sm:$0x7]  ;;  %v1195_v18 = vrot.slane %v1910_v14, 2 }
  0x47   : > { %1176 = vmatpush.bf16.msrb.mxu3 %v2021_v53  ;;  %v1196_v19 = vrot.slane %v1911_v15, 2 }
  0x48   : > { %797 = vmatpush.bf16.msrb.mxu0 %v1996_v25  ;;  %v1206_v23 = vsel %vm429_vm1, %v1910_v14, %v1195_v18  ;;  %v1207_v24 = vsel %vm433_vm3, %v1910_v14, %v1195_v18  ;;  %v2031_v25 = vld [vmem:[%s2468_s1 + $0x218] sm:$0xff]  ;;  %v1859_v18 = vld [vmem:[%s2165_s7 + $0x20] sm:$0x3] }
  0x49   : > { %1078 = vmatpush.bf16.msrb.mxu2 %v2012_v26  ;;  %v740_v9 = vld.sshfl [vmem:[#allocation1] sm:$0xff pattern:$0x73625140]  ;;  %v1203_v26 = vrot.slane %v1201_v22, 2  ;;  %v1209_v27 = vrot.slane %v1207_v24, 2  ;;  %v1212_v28 = vsel %vm429_vm1, %v1911_v15, %v1196_v19  ;;  %v1213_v30 = vsel %vm433_vm3, %v1911_v15, %v1196_v19 }
  0x4a   : > { %979 = vmatpush.bf16.msrb.mxu1 %v2004_v37  ;;  %912 = vst [vmem:[#allocation1] ss:$4 sm:$0xff] %v854_v7  ;;  %v1225_v37 = vshll.u32 %v1200_v21, 16  ;;  %v1235_v39 = vshrl.u32 %v1206_v23, 16  ;;  %v1238_v43 = vshll.u32 %v1206_v23, 16  ;;  %v1248_v45 = vshrl.u32 %v1212_v28, 16 }
  0x4b   : > { %1177 = vmatpush.bf16.msrb.mxu3 %v2020_v59  ;;  %798 = vmatmul.bf16.vlgmr.msrb.gmra.mxu0 %v740_v9  ;;  %915 = vst [vmem:[#allocation1 + $0x1] ss:$4 sm:$0xff] %v867_v8  ;;  %v1231_v38 = vshll.u32 %v1203_v26, 16  ;;  %v1244_v44 = vshll.u32 %v1209_v27, 16  ;;  %v1251_v49 = vshll.u32 %v1212_v28, 16  ;;  %v1261_v59 = vshrl.u32 %v1218_v32, 16 }
  0x4c   : > { %1352 = vmatpush.bf16.msra.mxu0 %v2035_v31  ;;  %918 = vst [vmem:[#allocation1 + $0x2] ss:$4 sm:$0xff] %v880_v10  ;;  %v1215_v31 = vrot.slane %v1213_v30, 2  ;;  %v1227_v47 = vrot.slane %v1225_v37, 7  ;;  %v1237_v48 = vrot.slane %v1235_v39, 6  ;;  %v1240_v52 = vrot.slane %v1238_v43, 7 }
  0x4d   : > { %921 = vst [vmem:[#allocation1 + $0x3] ss:$4 sm:$0xff] %v893_v13  ;;  %v1233_v51 = vrot.slane %v1231_v38, 7  ;;  %v1250_v53 = vrot.slane %v1248_v45, 6  ;;  %v1253_v58 = vrot.slane %v1251_v49, 7  ;;  %v1246_v62 = vrot.slane %v1244_v44, 7 }
  0x4e   : > { %v1257_v54 = vshll.u32 %v1215_v31, 16  ;;  %v1228_v57 = vor.u32 %v1227_v47, %v1224_v42  ;;  %v1241_v61 = vor.u32 %v1240_v52, %v1237_v48  ;;  %v1263_v3 = vrot.slane %v1261_v59, 6  ;;  %v2028_v10 = vld [vmem:[%s2468_s1 + $0x200] sm:$0xff]  ;;  %v1857_v15 = vld [vmem:[%s2165_s7 + $0x18] sm:$0x3] }
  0x4f   : > { %v1272_v9 = vrot.slane %v1270_v0, 7  ;;  %v1860_v19 = vld [vmem:[%s2165_s7 + $0x24] sm:$0x3] }
  0x50   : > { %1353 = vmatpush.bf16.msra.mxu0 %v2034_v56  ;;  %v1259_v63 = vrot.slane %v1257_v54, 7  ;;  %v1229_v1 = vrot.slane %v1228_v57, 2  ;;  %v1242_v5 = vrot.slane %v1241_v61, 2  ;;  %v1267_v8 = vor.u32 %v1266_v4, %v1263_v3 }
  0x51   : > { %v2071_v61 = vmov 1024.0  }
  0x52   : > { %v1234_v6 = vsel %vm2272_vm8, %v1229_v1, %v1233_v51  ;;  %v1247_v11 = vsel %vm2272_vm8, %v1242_v5, %v1246_v62  ;;  %v1268_v13 = vrot.slane %v1267_v8, 2  ;;  %2055 = vrcp.f32 %v2071_v61 }
  0x53   : > { %v2072_v1 = vmov 1023.0  }
  0x54   : > { %1354 = vmatpush.bf16.msra.mxu0 %v2033_v2  ;;  %v922_v56 = vld.sshfl [vmem:[#allocation1] sm:$0xff pattern:$0x73625140]  ;;  %v1254_v2 = vor.u32 %v1253_v58, %v1250_v53  ;;  %v1273_v14 = vsel %vm2272_vm8, %v1268_v13, %v1272_v9  ;;  %2057 = vrcp.f32 %v2072_v1 }
  0x55   : > { %1011 = vst [vmem:[#allocation1] ss:$4 sm:$0xff] %v1805_v35  ;;  %980 = vmatmul.bf16.vlgmr.msrb.gmra.mxu1 %v922_v56 }
  0x56   : > { %1014 = vst [vmem:[#allocation1 + $0x1] ss:$4 sm:$0xff] %v1806_v41  ;;  %v1255_v7 = vrot.slane %v1254_v2, 2 }
  0x57   : > { %1017 = vst [vmem:[#allocation1 + $0x2] ss:$4 sm:$0xff] %v1807_v46  ;;  %v2052_v46 = vld [vmem:[%s2469_s2] ss:$0 sm:$0xff] }
  0x58   : > { %1355 = vmatpush.bf16.msra.mxu0 %v2032_v12  ;;  %1020 = vst [vmem:[#allocation1 + $0x3] ss:$4 sm:$0xff] %v1808_v50  ;;  %v1260_v12 = vsel %vm2272_vm8, %v1255_v7, %v1259_v63  ;;  %v2056_v63 = vpop.eup %2055 }
  0x59   : > { %v1399_v2 = vmul.f32 1024.0, %v2056_v63  ;;  %vm1403_vm9 = vweird.f32 %v2056_v63 }
  0x5a   : > { %v2058_v5 = vpop.eup %2057 }
  0x5b   : > { %v1400_v3 = vsub.f32 1.0, %v1399_v2  ;;  %vm1414_vm10 = vweird.f32 %v2058_v5 }
  0x5c   : > { %1356 = vmatpush.bf16.msra.mxu0 %v2031_v25 }
  0x5f   : > { %v1021_v17 = vld.sshfl [vmem:[#allocation1] sm:$0xff pattern:$0x73625140] }
  0x60   : > { %1357 = vmatpush.bf16.msra.mxu0 %v2030_v40  ;;  %1079 = vmatmul.bf16.vlgmr.msrb.gmra.mxu2 %v1021_v17  ;;  %1110 = vst [vmem:[#allocation1] ss:$4 sm:$0xff] %v1857_v15 }
  0x61   : > { %1113 = vst [vmem:[#allocation1 + $0x1] ss:$4 sm:$0xff] %v1858_v16 }
  0x62   : > { %1116 = vst [vmem:[#allocation1 + $0x2] ss:$4 sm:$0xff] %v1859_v18 }
  0x63   : > { %1119 = vst [vmem:[#allocation1 + $0x3] ss:$4 sm:$0xff] %v1860_v19 }
  0x64   : > { %1358 = vmatpush.bf16.msra.mxu0 %v2029_v55 }
  0x68   : > { %1359 = vmatpush.bf16.msra.mxu0 %v2028_v10  ;;  %v1401_v10 = vmul.f32 %v2056_v63, %v1400_v3 }
  0x6a   : > { %v1120_v20 = vld.sshfl [vmem:[#allocation1] sm:$0xff pattern:$0x73625140]  ;;  %v1402_v16 = vadd.f32 %v2056_v63, %v1401_v10 }
  0x6b   : > { %1178 = vmatmul.bf16.vlgmr.msrb.gmra.mxu3 %v1120_v20  ;;  %1292 = vst [vmem:[#allocation1] ss:$4 sm:$0xff] %v1234_v6 }
  0x6c   : > { %1295 = vst [vmem:[#allocation1 + $0x1] ss:$4 sm:$0xff] %v1247_v11  ;;  %v1410_v11 = vmul.f32 1023.0, %v2058_v5 }
  0x6d   : > { %1298 = vst [vmem:[#allocation1 + $0x2] ss:$4 sm:$0xff] %v1260_v12 }
  0x6e   : > { %1301 = vst [vmem:[#allocation1 + $0x3] ss:$4 sm:$0xff] %v1273_v14  ;;  %v1411_v17 = vsub.f32 1.0, %v1410_v11 }
  0x75   : > { %v1302_v21 = vld.sshfl [vmem:[#allocation1] sm:$0xff pattern:$0x73625140] }
  0x76   : > { %1360 = vmatmul.bf16.vlgmr.msra.gmra.mxu0 %v1302_v21 }
  0xa8   : > { %v337_v29 = vpop.f32.mrf.mxu0 }
  0xaa   : > { %v412_v22 = vpop.f32.mrf.mxu1 }
  0xab   : > { %v413_v25 = vadd.f32 %v412_v22, %v337_v29  ;;  %v1404_v29 = vsel %vm1403_vm9, %v2056_v63, %v1402_v16  ;;  %v1412_v22 = vmul.f32 %v2058_v5, %v1411_v17 }
  0xb0   : > { %v339_v24 = vpop.f32.mrf.mxu0 }
  0xb2   : > { %v414_v27 = vpop.f32.mrf.mxu1 }
  0xb3   : > { %v415_v34 = vadd.f32 %v414_v27, %v339_v24 }
  0xb7   : > { %v601_v23 = vpop.f32.mrf.mxu2 }
  0xb8   : > { %v606_v28 = vadd.f32 %v601_v23, %v413_v25 }
  0xbf   : > { %v603_v30 = vpop.f32.mrf.mxu2 }
  0xc0   : > { %v607_v39 = vadd.f32 %v603_v30, %v415_v34 }
  0xc3   : > { %v700_v26 = vpop.f32.mrf.mxu3 }
  0xc4   : > { %v705_v32 = vadd.f32 %v700_v26, %v606_v28  ;;  %v1413_v26 = vadd.f32 %v2058_v5, %v1412_v22 }
  0xc8   : > { %v799_v31 = vpop.f32.mrf.mxu0 }
  0xc9   : > { %v804_v35 = vadd.f32 %v799_v31, %v705_v32  ;;  %v1415_v31 = vsel %vm1414_vm10, %v2058_v5, %v1413_v26 }
  0xcb   : > { %v702_v33 = vpop.f32.mrf.mxu3 }
  0xcc   : > { %v706_v42 = vadd.f32 %v702_v33, %v607_v39 }
  0xd0   : > { %v801_v38 = vpop.f32.mrf.mxu0 }
  0xd1   : > { %v805_v44 = vadd.f32 %v801_v38, %v706_v42 }
  0xd2   : > { %v981_v36 = vpop.f32.mrf.mxu1 }
  0xd3   : > { %v986_v40 = vadd.f32 %v981_v36, %v804_v35 }
  0xda   : > { %v983_v47 = vpop.f32.mrf.mxu1 }
  0xdb   : > { %v987_v51 = vadd.f32 %v983_v47, %v805_v44 }
  0xe3   : > { %v1080_v37 = vpop.f32.mrf.mxu2 }
  0xe4   : > { %v1085_v43 = vadd.f32 %v1080_v37, %v986_v40 }
  0xeb   : > { %v1082_v50 = vpop.f32.mrf.mxu2 }
  0xec   : > { %v1086_v54 = vadd.f32 %v1082_v50, %v987_v51  ;;  %v2054_v50 = vld [vmem:[%s2471_s4] ss:$0 sm:$0xff] }
  0xee   : > { %v1179_v41 = vpop.f32.mrf.mxu3 }
  0xef   : > { %v1184_v45 = vadd.f32 %v1179_v41, %v1085_v43 }
  0xf3   : > { %v1361_v48 = vpop.f32.mrf.mxu0 }
  0xf4   : > { %v1366_v49 = vadd.f32 %v1361_v48, %v1184_v45  ;;  %v2053_v48 = vld [vmem:[%s2470_s3] ss:$0 sm:$0xff] }
  0xf6   : > { %v2442_v52 = vadd.f32 %v2052_v46, %v1366_v49  ;;  %v1181_v53 = vpop.f32.mrf.mxu3 }
  0xf7   : > { %v1185_v56 = vadd.f32 %v1181_v53, %v1086_v54 }
  0xf8   : > { %1374 = vadd.xlane.f32.xlu0 %v2442_v52  ;;  %v1385_v55 = vmul.f32 %v2442_v52, %v2442_v52 }
  0xfa   : > { %1387 = vadd.xlane.f32.xlu1 %v1385_v55 }
  0xfb   : > { %v1363_v57 = vpop.f32.mrf.mxu0 }
  0xfc   : > { %v1367_v58 = vadd.f32 %v1363_v57, %v1185_v56 }
  0xfe   : > { %v2447_v59 = vadd.f32 %v2052_v46, %v1367_v58 }
 0x100   : > { %1376 = vadd.xlane.f32.xlu0 %v2447_v59  ;;  %v1386_v60 = vmul.f32 %v2447_v59, %v2447_v59 }
 0x102   : > { %1389 = vadd.xlane.f32.xlu1 %v1386_v60 }
 0x16b   : > { %v1375_v62 = vpop.xlane.xlu0 %1374 }
 0x16d   : > { %v1388_v0 = vpop.xlane.xlu1 %1387 }
 0x173   : > { %v1377_v4 = vpop.xlane.xlu0 %1376 }
 0x174   : > { %v1378_v6 = vadd.f32 %v1377_v4, %v1375_v62 }
 0x175   : > { %v1390_v7 = vpop.xlane.xlu1 %1389 }
 0x176   : > { %v1379_v8 = vrot.slane %v1378_v6, 4  ;;  %v1391_v9 = vadd.f32 %v1390_v7, %v1388_v0 }
 0x178   : > { %v1380_v12 = vadd.f32 %v1379_v8, %v1378_v6  ;;  %v1392_v13 = vrot.slane %v1391_v9, 4 }
 0x17a   : > { %v1381_v14 = vrot.slane %v1380_v12, 2  ;;  %v1393_v15 = vadd.f32 %v1392_v13, %v1391_v9 }
 0x17c   : > { %v1382_v18 = vadd.f32 %v1381_v14, %v1380_v12  ;;  %v1394_v19 = vrot.slane %v1393_v15, 2 }
 0x17e   : > { %v1383_v20 = vrot.slane %v1382_v18, 1  ;;  %v1395_v21 = vadd.f32 %v1394_v19, %v1393_v15 }
 0x180   : > { %v1384_v23 = vadd.f32 %v1383_v20, %v1382_v18  ;;  %v1396_v25 = vrot.slane %v1395_v21, 1 }
 0x182   : > { %v1405_v24 = vmul.f32 %v1404_v29, %v1384_v23  ;;  %v1397_v30 = vadd.f32 %v1396_v25, %v1395_v21 }
 0x184   : > { %v1406_v27 = vmul.f32 1024.0, %v1405_v24  ;;  %v1432_v46 = vsub.f32 %v2442_v52, %v1405_v24  ;;  %v1433_v47 = vsub.f32 %v2447_v59, %v1405_v24 }
 0x186   : > { %v1407_v28 = vmul.f32 %v1406_v27, %v1405_v24 }
 0x188   : > { %v1408_v32 = vsub.f32 %v1397_v30, %v1407_v28 }
 0x18a   : > { %v1416_v33 = vmul.f32 %v1415_v31, %v1408_v32 }
 0x18c   : > { %v1417_v34 = vmax.f32 %v1416_v33, 0.0 }
 0x18e   : > { %2059 = vrsqrt.f32 %v1417_v34  ;;  %vm1425_vm11 = vcmp.eq.f32.partialorder %v1417_v34, inf  ;;  %v1428_v42 = vand.u32 2147483648, %v1417_v34  ;;  %vm1427_vm12 = vcmp.eq.f32.partialorder %v1417_v34, 0.0 }
 0x194   : > { %v2060_v35 = vpop.eup %2059 }
 0x195   : > { %v1419_v36 = vmul.f32 %v2060_v35, %v1417_v34 }
 0x197   : > { %v1420_v37 = vmul.f32 %v2060_v35, %v1419_v36 }
 0x199   : > { %v1421_v38 = vmul.f32 0.5, %v1420_v37 }
 0x19b   : > { %v1422_v39 = vsub.f32 1.5, %v1421_v38 }
 0x19d   : > { %v1423_v40 = vmul.f32 %v2060_v35, %v1422_v39 }
 0x19f   : > { %v1424_v41 = vmul.f32 %v1423_v40, %v1417_v34 }
 0x1a1   : > { %v1426_v43 = vsel %vm1425_vm11, %v1417_v34, %v1424_v41 }
 0x1a2   : > { %v1429_v44 = vsel %vm1427_vm12, %v1428_v42, %v1426_v43 }
 0x1a3   : > { %v1430_v45 = vadd.f32 1e-05, %v1429_v44 }
 0x1a5   : > { %2061 = vrcp.f32 %v1430_v45 }
 0x1ab   : > { %v2062_v49 = vpop.eup %2061 }
 0x1ac   : > { %v1434_v51 = vmul.f32 %v2062_v49, %v1432_v46  ;;  %v1435_v53 = vmul.f32 %v2062_v49, %v1433_v47 }
 0x1ae   : > { %v1440_v54 = vmul.f32 %v2053_v48, %v1434_v51  ;;  %v1441_v55 = vmul.f32 %v2053_v48, %v1435_v53 }
 0x1b0   : > { %v1446_v56 = vadd.f32 %v2054_v50, %v1440_v54  ;;  %v1447_v57 = vadd.f32 %v2054_v50, %v1441_v55 }
 0x1b2   : > { %v1448_v58 = vmax.f32 %v1446_v56, 0.0  ;;  %v1449_v52 = vmax.f32 %v1447_v57, 0.0 }
 0x1b4   : > { %v2039_v59 = vpack.c.bf16 %v1449_v52, %v1448_v58 }
 0x1b6   : > { %2040 = vst [vmem:[%s224_s20] sm:$0xff] %v2039_v59  }
 0x1b7 PF: > { %s15_s18 = sadd.s32 1, %s2069_s18  }
 0x1b8   : > { %p12_p4 = scmp.ge.s32.totalorder %s15_s18, 4  }
 0x1ba   :  { %14 = sbr.rel (!%p12_p4) target bundleno = 1 (0x1), region = 110 }

</bundles_post_ra>
